<compile_context>
chip_gen: v5e
topology: v5e:2x2
jax: 0.10.0
libtpu: 0.0.40
codegen_flags: <defaults>
</compile_context>

<pallas_src>
import functools

import jax
import jax.numpy as jnp
from jax.experimental import pallas as pl
from jax.experimental.pallas import tpu as pltpu

_EPS = 1e-08
_KERNEL = 31
_PAD = 15
_INV_K2 = 1.0 / float(_KERNEL * _KERNEL)


def _round_up(x, m):
    return ((x + m - 1) // m) * m


def _choose_tb(b, hp, wp):
    """Slices per grid step: amortize per-step overhead, stay inside VMEM."""
    per_slice = hp * wp * 4  # bytes of one f32 (hp, wp) plane
    # ~24 MiB working budget: 2 inputs x 2 pipeline buffers + ~10 live f32
    # temporaries per slice. Fits v7x's 32 MiB default scoped VMEM (64 MiB
    # physical) with headroom; v5e/v6e have more physical VMEM.
    cap = max(1, (24 * 1024 * 1024) // (14 * per_slice))
    tb = max(1, min(b, cap, 8))
    if tb >= b and b > 1:
        # keep >= 2 grid steps so the "parallel" batch axis can feed both
        # TensorCores on v7x.
        tb = (b + 1) // 2
    return tb


def _hybrid_e_loss_kernel(pred_ref, mask_ref, ah_ref, aw_ref, out_ref, weit_ref,
                          *, h, w, tb):
    hp, wp = pred_ref.shape[1], pred_ref.shape[2]
    p = pred_ref[...]                 # (tb, hp, wp) logits (zero padded)
    m = mask_ref[...]                 # (tb, hp, wp) mask   (zero padded)
    ah = ah_ref[...]                  # (hp, hp) band matrix (|i-j| <= 15)
    aw = aw_ref[...]                  # (wp, wp) band matrix (|i-j| <= 15)

    # 31x31 average pool, stride 1, pad 15, count_include_pad=True:
    #   avg = (Ah @ M @ Aw) / 961.  Exact with the zero-padded layout: the band
    #   only ever reaches into explicit zeros, same as F.avg_pool2d's padding.
    mw = jnp.dot(m.reshape(tb * hp, wp), aw,
                 preferred_element_type=jnp.float32).reshape(tb, hp, wp)
    for t in range(tb):  # small static loop; per-slice left-multiply on the MXU
        box_t = jnp.dot(ah, mw[t], preferred_element_type=jnp.float32)
        weit_ref[t] = 1.0 + 5.0 * jnp.abs(box_t * _INV_K2 - m[t])
    weit = weit_ref[...]                                   # (tb, hp, wp)

    # One shared exp(-|p|) feeds both the BCE log-term and a stable sigmoid.
    e = jnp.exp(-jnp.abs(p))
    bce = jnp.maximum(p, 0.0) - p * m + jnp.log(1.0 + e)
    inv1pe = 1.0 / (1.0 + e)
    sp = jnp.where(p >= 0.0, inv1pe, e * inv1pe)           # sigmoid(p)

    # Reductions restricted to the true (h, w) window (padding contributes 0).
    if (hp != h) or (wp != w):
        row = jax.lax.broadcasted_iota(jnp.int32, (1, hp, wp), 1)
        col = jax.lax.broadcasted_iota(jnp.int32, (1, hp, wp), 2)
        vm = ((row < h) & (col < w)).astype(jnp.float32)

        def rsum(x):                                       # -> (tb, 1, 1)
            xm = x * vm
            return jnp.sum(jnp.sum(xm, axis=2, keepdims=True), axis=1,
                           keepdims=True)
    else:
        def rsum(x):
            return jnp.sum(jnp.sum(x, axis=2, keepdims=True), axis=1,
                           keepdims=True)

    inv_hw = 1.0 / float(h * w)

    bce_sum = rsum(bce)                                    # (tb, 1, 1)
    weit_sum = rsum(weit)
    inter = rsum(sp * m * weit)
    union = rsum((sp + m) * weit)

    # Enhanced-alignment (E-measure) term, per slice.
    mpred = rsum(sp) * inv_hw
    mmask = rsum(m) * inv_hw
    phi_fm = sp - mpred
    phi_gt = m - mmask
    efm = (2.0 * phi_fm * phi_gt + _EPS) / (phi_fm * phi_fm + phi_gt * phi_gt + _EPS)
    qfm = (1.0 + efm) * (1.0 + efm) * 0.25
    eloss = 1.0 - rsum(qfm) * inv_hw                       # (tb, 1, 1)

    # Single lane-dense store: stats packed into lanes 0..4 of a (tb,1,128) tile.
    lane = jax.lax.broadcasted_iota(jnp.int32, (tb, 1, 128), 2)
    packed = jnp.where(lane == 0, bce_sum, 0.0)
    packed = packed + jnp.where(lane == 1, weit_sum, 0.0)
    packed = packed + jnp.where(lane == 2, eloss, 0.0)
    packed = packed + jnp.where(lane == 3, inter, 0.0)
    packed = packed + jnp.where(lane == 4, union, 0.0)
    out_ref[...] = packed


@jax.jit
def hybrid_e_loss(pred, mask):
    """pred, mask: float arrays of shape (N, C, H, W). Returns scalar loss."""
    n, c, h, w = pred.shape
    b = n * c
    hp = _round_up(h, 8)           # sublane-aligned rows
    wp = _round_up(w, 128)         # lane-dense columns
    tb = _choose_tb(b, hp, wp)
    b_pad = _round_up(b, tb)
    steps = b_pad // tb

    p = jnp.pad(pred.reshape(b, h, w).astype(jnp.float32),
                ((0, b_pad - b), (0, hp - h), (0, wp - w)))
    m = jnp.pad(mask.reshape(b, h, w).astype(jnp.float32),
                ((0, b_pad - b), (0, hp - h), (0, wp - w)))

    # Band matrices implementing the separable 31x31 box filter with zero pad.
    # TODO(synk): for strictly-binary masks these (and the mask operand) could
    # be cast to bfloat16 to run the box-filter matmuls at full MXU rate; kept
    # f32 here so soft masks stay bit-exact vs the PyTorch reference.
    ih = jnp.arange(hp)
    ah = (jnp.abs(ih[:, None] - ih[None, :]) <= _PAD).astype(jnp.float32)
    iw = jnp.arange(wp)
    aw = (jnp.abs(iw[:, None] - iw[None, :]) <= _PAD).astype(jnp.float32)

    kernel = functools.partial(_hybrid_e_loss_kernel, h=h, w=w, tb=tb)
    out = pl.pallas_call(
        kernel,
        out_shape=jax.ShapeDtypeStruct((b_pad, 1, 128), jnp.float32),
        grid=(steps,),
        in_specs=[
            pl.BlockSpec((tb, hp, wp), lambda i: (i, 0, 0)),   # pred slices
            pl.BlockSpec((tb, hp, wp), lambda i: (i, 0, 0)),   # mask slices
            pl.BlockSpec((hp, hp), lambda i: (0, 0)),          # Ah (shared)
            pl.BlockSpec((wp, wp), lambda i: (0, 0)),          # Aw (shared)
        ],
        out_specs=pl.BlockSpec((tb, 1, 128), lambda i: (i, 0, 0)),
        scratch_shapes=[pltpu.VMEM((tb, hp, wp), jnp.float32)],  # weit
        compiler_params=pltpu.CompilerParams(
            dimension_semantics=("parallel",),
            vmem_limit_bytes=48 * 1024 * 1024),
    )(p, m, ah, aw)

    stats = out[:b, 0, :]                                   # (b, 128)
    bce_sum = stats[:, 0].reshape(n, c)
    weit_sum = stats[:, 1].reshape(n, c)
    eloss = stats[:, 2].reshape(n, c)
    inter = stats[:, 3].reshape(n, c)
    union = stats[:, 4].reshape(n, c)

    # PyTorch's legacy reduce='none' path -> reduction='mean' (global scalar).
    bce_mean = jnp.sum(bce_sum) / float(n * c * h * w)
    wbce = (weit_sum * bce_mean + _EPS) / (weit_sum + _EPS)
    wiou = 1.0 - (inter + 1.0 + _EPS) / (union - inter + 1.0 + _EPS)
    return jnp.mean(wbce + eloss + wiou)


def _reference_loss(pred, mask):
    """Pure-JAX reference mirroring the PyTorch forward (for sanity check)."""
    n, c, h, w = pred.shape
    pred = pred.astype(jnp.float32)
    mask = mask.astype(jnp.float32)
    ih = jnp.arange(h)
    ah = (jnp.abs(ih[:, None] - ih[None, :]) <= _PAD).astype(jnp.float32)
    iw = jnp.arange(w)
    aw = (jnp.abs(iw[:, None] - iw[None, :]) <= _PAD).astype(jnp.float32)
    avg = jnp.einsum('ij,ncjk,lk->ncil', ah, mask, aw) / float(_KERNEL * _KERNEL)
    weit = 1.0 + 5.0 * jnp.abs(avg - mask)
    bce = jnp.maximum(pred, 0.0) - pred * mask + jnp.log(1.0 + jnp.exp(-jnp.abs(pred)))
    bce_mean = jnp.mean(bce)                      # legacy reduce='none' -> mean
    weit_sum = jnp.sum(weit, axis=(2, 3))
    wbce = (weit_sum * bce_mean + _EPS) / (weit_sum + _EPS)
    sp = 1.0 / (1.0 + jnp.exp(-pred))
    phi_fm = sp - jnp.mean(sp, axis=(2, 3), keepdims=True)
    phi_gt = mask - jnp.mean(mask, axis=(2, 3), keepdims=True)
    efm = (2.0 * phi_fm * phi_gt + _EPS) / (phi_fm ** 2 + phi_gt ** 2 + _EPS)
    qfm = (1.0 + efm) ** 2 / 4.0
    eloss = 1.0 - jnp.mean(qfm, axis=(2, 3))
    inter = jnp.sum(sp * mask * weit, axis=(2, 3))
    union = jnp.sum((sp + mask) * weit, axis=(2, 3))
    wiou = 1.0 - (inter + 1.0 + _EPS) / (union - inter + 1.0 + _EPS)
    return jnp.mean(wbce + eloss + wiou)


if __name__ == "__main__":
    key = jax.random.PRNGKey(0)
    k_pred, k_mask = jax.random.split(key)
    N, C, H, W = 2, 4, 16, 16
    pred = jax.random.normal(k_pred, (N, C, H, W), dtype=jnp.float32)   # logits
    mask = jax.random.uniform(k_mask, (N, C, H, W), dtype=jnp.float32)  # soft GT in [0, 1]

    loss = hybrid_e_loss(pred, mask)
    loss = jax.block_until_ready(loss)

    ref = jax.block_until_ready(_reference_loss(pred, mask))
    assert jnp.allclose(loss, ref, rtol=1e-5, atol=1e-5), (loss, ref)

    print("KERNEL_OK")
</pallas_src>

<mosaic_0001>
module attributes {stable_mosaic.version = 11 : i64} {
  func.func @_hybrid_e_loss_kernel(%arg0: i32, %arg1: memref<4x16x128xf32, #tpu.memory_space<vmem>>, %arg2: memref<4x16x128xf32, #tpu.memory_space<vmem>>, %arg3: memref<16x16xf32, #tpu.memory_space<vmem>>, %arg4: memref<128x128xf32, #tpu.memory_space<vmem>>, %arg5: memref<4x1x128xf32, #tpu.memory_space<vmem>>, %arg6: memref<4x16x128xf32, #tpu.memory_space<vmem>>) attributes {dimension_semantics = [#tpu.dimension_semantics<parallel>], iteration_bounds = array<i64: 2>, scalar_prefetch = 0 : i64, scratch_operands = 1 : i64, tpu.core_type = #tpu.core_type<tc>, window_params = [{transform_indices = @transform_0, window_bounds = array<i64: 4, 16, 128>}, {transform_indices = @transform_1, window_bounds = array<i64: 4, 16, 128>}, {pipeline_mode = #tpu.pipeline_mode<synchronous>, transform_indices = @transform_2, window_bounds = array<i64: 16, 16>}, {pipeline_mode = #tpu.pipeline_mode<synchronous>, transform_indices = @transform_3, window_bounds = array<i64: 128, 128>}, {transform_indices = @transform_4, window_bounds = array<i64: 4, 1, 128>}]} {
    %c0 = arith.constant 0 : index
    %c0_0 = arith.constant 0 : index
    %c0_1 = arith.constant 0 : index
    %0 = vector.load %arg1[%c0, %c0_0, %c0_1] : memref<4x16x128xf32, #tpu.memory_space<vmem>>, vector<4x16x128xf32>
    %c0_2 = arith.constant 0 : index
    %c0_3 = arith.constant 0 : index
    %c0_4 = arith.constant 0 : index
    %1 = vector.load %arg2[%c0_2, %c0_3, %c0_4] : memref<4x16x128xf32, #tpu.memory_space<vmem>>, vector<4x16x128xf32>
    %c0_5 = arith.constant 0 : index
    %c0_6 = arith.constant 0 : index
    %2 = vector.load %arg3[%c0_5, %c0_6] : memref<16x16xf32, #tpu.memory_space<vmem>>, vector<16x16xf32>
    %c0_7 = arith.constant 0 : index
    %c0_8 = arith.constant 0 : index
    %3 = vector.load %arg4[%c0_7, %c0_8] : memref<128x128xf32, #tpu.memory_space<vmem>>, vector<128x128xf32>
    %4 = vector.shape_cast %1 : vector<4x16x128xf32> to vector<64x128xf32>
    %cst = arith.constant dense<0.000000e+00> : vector<64x128xf32>
    %5 = tpu.matmul %4, %3, %cst {dimension_numbers = #tpu.dot_dimension_numbers<[1], [0], [0], [1], [0, 0, 1, 1], [], []>} : vector<64x128xf32>, vector<128x128xf32>, vector<64x128xf32> -> vector<64x128xf32>
    %6 = vector.shape_cast %5 : vector<64x128xf32> to vector<4x16x128xf32>
    %7 = vector.extract_strided_slice %6 {offsets = [0, 0, 0], sizes = [1, 16, 128], strides = [1, 1, 1]} : vector<4x16x128xf32> to vector<1x16x128xf32>
    %8 = vector.shape_cast %7 : vector<1x16x128xf32> to vector<16x128xf32>
    %cst_9 = arith.constant dense<0.000000e+00> : vector<16x128xf32>
    %9 = tpu.matmul %2, %8, %cst_9 {dimension_numbers = #tpu.dot_dimension_numbers<[1], [0], [0], [1], [0, 0, 1, 1], [], []>} : vector<16x16xf32>, vector<16x128xf32>, vector<16x128xf32> -> vector<16x128xf32>
    %cst_10 = arith.constant 0.00104058278 : f32
    %10 = vector.broadcast %cst_10 : f32 to vector<16x128xf32>
    %11 = arith.mulf %9, %10 : vector<16x128xf32>
    %12 = vector.extract_strided_slice %1 {offsets = [0, 0, 0], sizes = [1, 16, 128], strides = [1, 1, 1]} : vector<4x16x128xf32> to vector<1x16x128xf32>
    %13 = vector.shape_cast %12 : vector<1x16x128xf32> to vector<16x128xf32>
    %14 = arith.subf %11, %13 : vector<16x128xf32>
    %15 = math.absf %14 : vector<16x128xf32>
    %cst_11 = arith.constant 5.000000e+00 : f32
    %16 = vector.broadcast %cst_11 : f32 to vector<16x128xf32>
    %17 = arith.mulf %16, %15 : vector<16x128xf32>
    %cst_12 = arith.constant 1.000000e+00 : f32
    %18 = vector.broadcast %cst_12 : f32 to vector<16x128xf32>
    %19 = arith.addf %18, %17 : vector<16x128xf32>
    %c0_13 = arith.constant 0 : index
    %c0_14 = arith.constant 0 : index
    %c0_15 = arith.constant 0 : index
    %20 = vector.load %arg6[%c0_13, %c0_14, %c0_15] : memref<4x16x128xf32, #tpu.memory_space<vmem>>, vector<1x16x128xf32>
    %21 = vector.shape_cast %20 : vector<1x16x128xf32> to vector<16x128xf32>
    %22 = vector.shape_cast %19 : vector<16x128xf32> to vector<1x16x128xf32>
    tpu.vector_store %arg6[%c0_13, %c0_14, %c0_15], %22 {strides = array<i32>} : memref<4x16x128xf32, #tpu.memory_space<vmem>>, vector<1x16x128xf32>,
    %23 = vector.extract_strided_slice %6 {offsets = [1, 0, 0], sizes = [1, 16, 128], strides = [1, 1, 1]} : vector<4x16x128xf32> to vector<1x16x128xf32>
    %24 = vector.shape_cast %23 : vector<1x16x128xf32> to vector<16x128xf32>
    %cst_16 = arith.constant dense<0.000000e+00> : vector<16x128xf32>
    %25 = tpu.matmul %2, %24, %cst_16 {dimension_numbers = #tpu.dot_dimension_numbers<[1], [0], [0], [1], [0, 0, 1, 1], [], []>} : vector<16x16xf32>, vector<16x128xf32>, vector<16x128xf32> -> vector<16x128xf32>
    %cst_17 = arith.constant 0.00104058278 : f32
    %26 = vector.broadcast %cst_17 : f32 to vector<16x128xf32>
    %27 = arith.mulf %25, %26 : vector<16x128xf32>
    %28 = vector.extract_strided_slice %1 {offsets = [1, 0, 0], sizes = [1, 16, 128], strides = [1, 1, 1]} : vector<4x16x128xf32> to vector<1x16x128xf32>
    %29 = vector.shape_cast %28 : vector<1x16x128xf32> to vector<16x128xf32>
    %30 = arith.subf %27, %29 : vector<16x128xf32>
    %31 = math.absf %30 : vector<16x128xf32>
    %cst_18 = arith.constant 5.000000e+00 : f32
    %32 = vector.broadcast %cst_18 : f32 to vector<16x128xf32>
    %33 = arith.mulf %32, %31 : vector<16x128xf32>
    %cst_19 = arith.constant 1.000000e+00 : f32
    %34 = vector.broadcast %cst_19 : f32 to vector<16x128xf32>
    %35 = arith.addf %34, %33 : vector<16x128xf32>
    %c1 = arith.constant 1 : index
    %c0_20 = arith.constant 0 : index
    %c0_21 = arith.constant 0 : index
    %36 = vector.load %arg6[%c1, %c0_20, %c0_21] : memref<4x16x128xf32, #tpu.memory_space<vmem>>, vector<1x16x128xf32>
    %37 = vector.shape_cast %36 : vector<1x16x128xf32> to vector<16x128xf32>
    %38 = vector.shape_cast %35 : vector<16x128xf32> to vector<1x16x128xf32>
    tpu.vector_store %arg6[%c1, %c0_20, %c0_21], %38 {strides = array<i32>} : memref<4x16x128xf32, #tpu.memory_space<vmem>>, vector<1x16x128xf32>,
    %39 = vector.extract_strided_slice %6 {offsets = [2, 0, 0], sizes = [1, 16, 128], strides = [1, 1, 1]} : vector<4x16x128xf32> to vector<1x16x128xf32>
    %40 = vector.shape_cast %39 : vector<1x16x128xf32> to vector<16x128xf32>
    %cst_22 = arith.constant dense<0.000000e+00> : vector<16x128xf32>
    %41 = tpu.matmul %2, %40, %cst_22 {dimension_numbers = #tpu.dot_dimension_numbers<[1], [0], [0], [1], [0, 0, 1, 1], [], []>} : vector<16x16xf32>, vector<16x128xf32>, vector<16x128xf32> -> vector<16x128xf32>
    %cst_23 = arith.constant 0.00104058278 : f32
    %42 = vector.broadcast %cst_23 : f32 to vector<16x128xf32>
    %43 = arith.mulf %41, %42 : vector<16x128xf32>
    %44 = vector.extract_strided_slice %1 {offsets = [2, 0, 0], sizes = [1, 16, 128], strides = [1, 1, 1]} : vector<4x16x128xf32> to vector<1x16x128xf32>
    %45 = vector.shape_cast %44 : vector<1x16x128xf32> to vector<16x128xf32>
    %46 = arith.subf %43, %45 : vector<16x128xf32>
    %47 = math.absf %46 : vector<16x128xf32>
    %cst_24 = arith.constant 5.000000e+00 : f32
    %48 = vector.broadcast %cst_24 : f32 to vector<16x128xf32>
    %49 = arith.mulf %48, %47 : vector<16x128xf32>
    %cst_25 = arith.constant 1.000000e+00 : f32
    %50 = vector.broadcast %cst_25 : f32 to vector<16x128xf32>
    %51 = arith.addf %50, %49 : vector<16x128xf32>
    %c2 = arith.constant 2 : index
    %c0_26 = arith.constant 0 : index
    %c0_27 = arith.constant 0 : index
    %52 = vector.load %arg6[%c2, %c0_26, %c0_27] : memref<4x16x128xf32, #tpu.memory_space<vmem>>, vector<1x16x128xf32>
    %53 = vector.shape_cast %52 : vector<1x16x128xf32> to vector<16x128xf32>
    %54 = vector.shape_cast %51 : vector<16x128xf32> to vector<1x16x128xf32>
    tpu.vector_store %arg6[%c2, %c0_26, %c0_27], %54 {strides = array<i32>} : memref<4x16x128xf32, #tpu.memory_space<vmem>>, vector<1x16x128xf32>,
    %55 = vector.extract_strided_slice %6 {offsets = [3, 0, 0], sizes = [1, 16, 128], strides = [1, 1, 1]} : vector<4x16x128xf32> to vector<1x16x128xf32>
    %56 = vector.shape_cast %55 : vector<1x16x128xf32> to vector<16x128xf32>
    %cst_28 = arith.constant dense<0.000000e+00> : vector<16x128xf32>
    %57 = tpu.matmul %2, %56, %cst_28 {dimension_numbers = #tpu.dot_dimension_numbers<[1], [0], [0], [1], [0, 0, 1, 1], [], []>} : vector<16x16xf32>, vector<16x128xf32>, vector<16x128xf32> -> vector<16x128xf32>
    %cst_29 = arith.constant 0.00104058278 : f32
    %58 = vector.broadcast %cst_29 : f32 to vector<16x128xf32>
    %59 = arith.mulf %57, %58 : vector<16x128xf32>
    %60 = vector.extract_strided_slice %1 {offsets = [3, 0, 0], sizes = [1, 16, 128], strides = [1, 1, 1]} : vector<4x16x128xf32> to vector<1x16x128xf32>
    %61 = vector.shape_cast %60 : vector<1x16x128xf32> to vector<16x128xf32>
    %62 = arith.subf %59, %61 : vector<16x128xf32>
    %63 = math.absf %62 : vector<16x128xf32>
    %cst_30 = arith.constant 5.000000e+00 : f32
    %64 = vector.broadcast %cst_30 : f32 to vector<16x128xf32>
    %65 = arith.mulf %64, %63 : vector<16x128xf32>
    %cst_31 = arith.constant 1.000000e+00 : f32
    %66 = vector.broadcast %cst_31 : f32 to vector<16x128xf32>
    %67 = arith.addf %66, %65 : vector<16x128xf32>
    %c3 = arith.constant 3 : index
    %c0_32 = arith.constant 0 : index
    %c0_33 = arith.constant 0 : index
    %68 = vector.load %arg6[%c3, %c0_32, %c0_33] : memref<4x16x128xf32, #tpu.memory_space<vmem>>, vector<1x16x128xf32>
    %69 = vector.shape_cast %68 : vector<1x16x128xf32> to vector<16x128xf32>
    %70 = vector.shape_cast %67 : vector<16x128xf32> to vector<1x16x128xf32>
    tpu.vector_store %arg6[%c3, %c0_32, %c0_33], %70 {strides = array<i32>} : memref<4x16x128xf32, #tpu.memory_space<vmem>>, vector<1x16x128xf32>,
    %c0_34 = arith.constant 0 : index
    %c0_35 = arith.constant 0 : index
    %c0_36 = arith.constant 0 : index
    %71 = vector.load %arg6[%c0_34, %c0_35, %c0_36] : memref<4x16x128xf32, #tpu.memory_space<vmem>>, vector<4x16x128xf32>
    %72 = math.absf %0 : vector<4x16x128xf32>
    %cst_37 = arith.constant 0.000000e+00 : f32
    %73 = vector.broadcast %cst_37 : f32 to vector<4x16x128xf32>
    %74 = arith.subf %73, %72 : vector<4x16x128xf32>
    %75 = math.exp %74 : vector<4x16x128xf32>
    %cst_38 = arith.constant 0.000000e+00 : f32
    %76 = vector.broadcast %cst_38 : f32 to vector<4x16x128xf32>
    %77 = arith.maximumf %0, %76 : vector<4x16x128xf32>
    %78 = arith.mulf %0, %1 : vector<4x16x128xf32>
    %79 = arith.subf %77, %78 : vector<4x16x128xf32>
    %cst_39 = arith.constant 1.000000e+00 : f32
    %80 = vector.broadcast %cst_39 : f32 to vector<4x16x128xf32>
    %81 = arith.addf %80, %75 : vector<4x16x128xf32>
    %82 = math.log %81 : vector<4x16x128xf32>
    %83 = arith.addf %79, %82 : vector<4x16x128xf32>
    %cst_40 = arith.constant 1.000000e+00 : f32
    %84 = vector.broadcast %cst_40 : f32 to vector<4x16x128xf32>
    %85 = arith.addf %84, %75 : vector<4x16x128xf32>
    %cst_41 = arith.constant 1.000000e+00 : f32
    %86 = vector.broadcast %cst_41 : f32 to vector<4x16x128xf32>
    %87 = arith.divf %86, %85 : vector<4x16x128xf32>
    %cst_42 = arith.constant 0.000000e+00 : f32
    %88 = vector.broadcast %cst_42 : f32 to vector<4x16x128xf32>
    %89 = arith.cmpf oge, %0, %88 : vector<4x16x128xf32>
    %90 = arith.mulf %75, %87 : vector<4x16x128xf32>
    %91 = arith.select %89, %87, %90 : vector<4x16x128xi1>, vector<4x16x128xf32>
    %92 = tpu.iota {dimensions = array<i32: 1>} : vector<1x16x128xi32>
    %93 = tpu.iota {dimensions = array<i32: 2>} : vector<1x16x128xi32>
    %c16_i32 = arith.constant 16 : i32
    %94 = vector.broadcast %c16_i32 : i32 to vector<1x16x128xi32>
    %95 = arith.cmpi slt, %92, %94 : vector<1x16x128xi32>
    %c16_i32_43 = arith.constant 16 : i32
    %96 = vector.broadcast %c16_i32_43 : i32 to vector<1x16x128xi32>
    %97 = arith.cmpi slt, %93, %96 : vector<1x16x128xi32>
    %98 = arith.andi %95, %97 : vector<1x16x128xi1>
    %99 = arith.extui %98 : vector<1x16x128xi1> to vector<1x16x128xi32>
    %100 = arith.sitofp %99 : vector<1x16x128xi32> to vector<1x16x128xf32>
    %101 = vector.broadcast %100 : vector<1x16x128xf32> to vector<4x16x128xf32>
    %102 = arith.mulf %83, %101 : vector<4x16x128xf32>
    %cst_44 = arith.constant dense<0.000000e+00> : vector<4x16xf32>
    %103 = vector.multi_reduction <add>, %102, %cst_44 [2] : vector<4x16x128xf32> to vector<4x16xf32>
    %104 = vector.shape_cast %103 : vector<4x16xf32> to vector<4x16x1xf32>
    %cst_45 = arith.constant dense<0.000000e+00> : vector<4x1xf32>
    %105 = vector.multi_reduction <add>, %104, %cst_45 [1] : vector<4x16x1xf32> to vector<4x1xf32>
    %106 = vector.shape_cast %105 : vector<4x1xf32> to vector<4x1x1xf32>
    %107 = vector.broadcast %100 : vector<1x16x128xf32> to vector<4x16x128xf32>
    %108 = arith.mulf %71, %107 : vector<4x16x128xf32>
    %cst_46 = arith.constant dense<0.000000e+00> : vector<4x16xf32>
    %109 = vector.multi_reduction <add>, %108, %cst_46 [2] : vector<4x16x128xf32> to vector<4x16xf32>
    %110 = vector.shape_cast %109 : vector<4x16xf32> to vector<4x16x1xf32>
    %cst_47 = arith.constant dense<0.000000e+00> : vector<4x1xf32>
    %111 = vector.multi_reduction <add>, %110, %cst_47 [1] : vector<4x16x1xf32> to vector<4x1xf32>
    %112 = vector.shape_cast %111 : vector<4x1xf32> to vector<4x1x1xf32>
    %113 = arith.mulf %91, %1 : vector<4x16x128xf32>
    %114 = arith.mulf %113, %71 : vector<4x16x128xf32>
    %115 = vector.broadcast %100 : vector<1x16x128xf32> to vector<4x16x128xf32>
    %116 = arith.mulf %114, %115 : vector<4x16x128xf32>
    %cst_48 = arith.constant dense<0.000000e+00> : vector<4x16xf32>
    %117 = vector.multi_reduction <add>, %116, %cst_48 [2] : vector<4x16x128xf32> to vector<4x16xf32>
    %118 = vector.shape_cast %117 : vector<4x16xf32> to vector<4x16x1xf32>
    %cst_49 = arith.constant dense<0.000000e+00> : vector<4x1xf32>
    %119 = vector.multi_reduction <add>, %118, %cst_49 [1] : vector<4x16x1xf32> to vector<4x1xf32>
    %120 = vector.shape_cast %119 : vector<4x1xf32> to vector<4x1x1xf32>
    %121 = arith.addf %91, %1 : vector<4x16x128xf32>
    %122 = arith.mulf %121, %71 : vector<4x16x128xf32>
    %123 = vector.broadcast %100 : vector<1x16x128xf32> to vector<4x16x128xf32>
    %124 = arith.mulf %122, %123 : vector<4x16x128xf32>
    %cst_50 = arith.constant dense<0.000000e+00> : vector<4x16xf32>
    %125 = vector.multi_reduction <add>, %124, %cst_50 [2] : vector<4x16x128xf32> to vector<4x16xf32>
    %126 = vector.shape_cast %125 : vector<4x16xf32> to vector<4x16x1xf32>
    %cst_51 = arith.constant dense<0.000000e+00> : vector<4x1xf32>
    %127 = vector.multi_reduction <add>, %126, %cst_51 [1] : vector<4x16x1xf32> to vector<4x1xf32>
    %128 = vector.shape_cast %127 : vector<4x1xf32> to vector<4x1x1xf32>
    %129 = vector.broadcast %100 : vector<1x16x128xf32> to vector<4x16x128xf32>
    %130 = arith.mulf %91, %129 : vector<4x16x128xf32>
    %cst_52 = arith.constant dense<0.000000e+00> : vector<4x16xf32>
    %131 = vector.multi_reduction <add>, %130, %cst_52 [2] : vector<4x16x128xf32> to vector<4x16xf32>
    %132 = vector.shape_cast %131 : vector<4x16xf32> to vector<4x16x1xf32>
    %cst_53 = arith.constant dense<0.000000e+00> : vector<4x1xf32>
    %133 = vector.multi_reduction <add>, %132, %cst_53 [1] : vector<4x16x1xf32> to vector<4x1xf32>
    %134 = vector.shape_cast %133 : vector<4x1xf32> to vector<4x1x1xf32>
    %cst_54 = arith.constant 3.906250e-03 : f32
    %135 = vector.broadcast %cst_54 : f32 to vector<4x1x1xf32>
    %136 = arith.mulf %134, %135 : vector<4x1x1xf32>
    %137 = vector.broadcast %100 : vector<1x16x128xf32> to vector<4x16x128xf32>
    %138 = arith.mulf %1, %137 : vector<4x16x128xf32>
    %cst_55 = arith.constant dense<0.000000e+00> : vector<4x16xf32>
    %139 = vector.multi_reduction <add>, %138, %cst_55 [2] : vector<4x16x128xf32> to vector<4x16xf32>
    %140 = vector.shape_cast %139 : vector<4x16xf32> to vector<4x16x1xf32>
    %cst_56 = arith.constant dense<0.000000e+00> : vector<4x1xf32>
    %141 = vector.multi_reduction <add>, %140, %cst_56 [1] : vector<4x16x1xf32> to vector<4x1xf32>
    %142 = vector.shape_cast %141 : vector<4x1xf32> to vector<4x1x1xf32>
    %cst_57 = arith.constant 3.906250e-03 : f32
    %143 = vector.broadcast %cst_57 : f32 to vector<4x1x1xf32>
    %144 = arith.mulf %142, %143 : vector<4x1x1xf32>
    %145 = vector.broadcast %136 : vector<4x1x1xf32> to vector<4x16x128xf32>
    %146 = arith.subf %91, %145 : vector<4x16x128xf32>
    %147 = vector.broadcast %144 : vector<4x1x1xf32> to vector<4x16x128xf32>
    %148 = arith.subf %1, %147 : vector<4x16x128xf32>
    %cst_58 = arith.constant 2.000000e+00 : f32
    %149 = vector.broadcast %cst_58 : f32 to vector<4x16x128xf32>
    %150 = arith.mulf %149, %146 : vector<4x16x128xf32>
    %151 = arith.mulf %150, %148 : vector<4x16x128xf32>
    %cst_59 = arith.constant 9.99999993E-9 : f32
    %152 = vector.broadcast %cst_59 : f32 to vector<4x16x128xf32>
    %153 = arith.addf %151, %152 : vector<4x16x128xf32>
    %154 = arith.mulf %146, %146 : vector<4x16x128xf32>
    %155 = arith.mulf %148, %148 : vector<4x16x128xf32>
    %156 = arith.addf %154, %155 : vector<4x16x128xf32>
    %cst_60 = arith.constant 9.99999993E-9 : f32
    %157 = vector.broadcast %cst_60 : f32 to vector<4x16x128xf32>
    %158 = arith.addf %156, %157 : vector<4x16x128xf32>
    %159 = arith.divf %153, %158 : vector<4x16x128xf32>
    %cst_61 = arith.constant 1.000000e+00 : f32
    %160 = vector.broadcast %cst_61 : f32 to vector<4x16x128xf32>
    %161 = arith.addf %160, %159 : vector<4x16x128xf32>
    %cst_62 = arith.constant 1.000000e+00 : f32
    %162 = vector.broadcast %cst_62 : f32 to vector<4x16x128xf32>
    %163 = arith.addf %162, %159 : vector<4x16x128xf32>
    %164 = arith.mulf %161, %163 : vector<4x16x128xf32>
    %cst_63 = arith.constant 2.500000e-01 : f32
    %165 = vector.broadcast %cst_63 : f32 to vector<4x16x128xf32>
    %166 = arith.mulf %164, %165 : vector<4x16x128xf32>
    %167 = vector.broadcast %100 : vector<1x16x128xf32> to vector<4x16x128xf32>
    %168 = arith.mulf %166, %167 : vector<4x16x128xf32>
    %cst_64 = arith.constant dense<0.000000e+00> : vector<4x16xf32>
    %169 = vector.multi_reduction <add>, %168, %cst_64 [2] : vector<4x16x128xf32> to vector<4x16xf32>
    %170 = vector.shape_cast %169 : vector<4x16xf32> to vector<4x16x1xf32>
    %cst_65 = arith.constant dense<0.000000e+00> : vector<4x1xf32>
    %171 = vector.multi_reduction <add>, %170, %cst_65 [1] : vector<4x16x1xf32> to vector<4x1xf32>
    %172 = vector.shape_cast %171 : vector<4x1xf32> to vector<4x1x1xf32>
    %cst_66 = arith.constant 3.906250e-03 : f32
    %173 = vector.broadcast %cst_66 : f32 to vector<4x1x1xf32>
    %174 = arith.mulf %172, %173 : vector<4x1x1xf32>
    %cst_67 = arith.constant 1.000000e+00 : f32
    %175 = vector.broadcast %cst_67 : f32 to vector<4x1x1xf32>
    %176 = arith.subf %175, %174 : vector<4x1x1xf32>
    %177 = tpu.iota {dimensions = array<i32: 2>} : vector<4x1x128xi32>
    %c0_i32 = arith.constant 0 : i32
    %178 = vector.broadcast %c0_i32 : i32 to vector<4x1x128xi32>
    %179 = arith.cmpi eq, %177, %178 : vector<4x1x128xi32>
    %cst_68 = arith.constant 0.000000e+00 : f32
    %180 = vector.shape_cast %106 : vector<4x1x1xf32> to vector<4x1x1xf32>
    %181 = vector.broadcast %180 : vector<4x1x1xf32> to vector<4x1x128xf32>
    %182 = vector.broadcast %cst_68 : f32 to vector<4x1x128xf32>
    %183 = arith.select %179, %181, %182 : vector<4x1x128xi1>, vector<4x1x128xf32>
    %c1_i32 = arith.constant 1 : i32
    %184 = vector.broadcast %c1_i32 : i32 to vector<4x1x128xi32>
    %185 = arith.cmpi eq, %177, %184 : vector<4x1x128xi32>
    %cst_69 = arith.constant 0.000000e+00 : f32
    %186 = vector.shape_cast %112 : vector<4x1x1xf32> to vector<4x1x1xf32>
    %187 = vector.broadcast %186 : vector<4x1x1xf32> to vector<4x1x128xf32>
    %188 = vector.broadcast %cst_69 : f32 to vector<4x1x128xf32>
    %189 = arith.select %185, %187, %188 : vector<4x1x128xi1>, vector<4x1x128xf32>
    %190 = arith.addf %183, %189 : vector<4x1x128xf32>
    %c2_i32 = arith.constant 2 : i32
    %191 = vector.broadcast %c2_i32 : i32 to vector<4x1x128xi32>
    %192 = arith.cmpi eq, %177, %191 : vector<4x1x128xi32>
    %cst_70 = arith.constant 0.000000e+00 : f32
    %193 = vector.shape_cast %176 : vector<4x1x1xf32> to vector<4x1x1xf32>
    %194 = vector.broadcast %193 : vector<4x1x1xf32> to vector<4x1x128xf32>
    %195 = vector.broadcast %cst_70 : f32 to vector<4x1x128xf32>
    %196 = arith.select %192, %194, %195 : vector<4x1x128xi1>, vector<4x1x128xf32>
    %197 = arith.addf %190, %196 : vector<4x1x128xf32>
    %c3_i32 = arith.constant 3 : i32
    %198 = vector.broadcast %c3_i32 : i32 to vector<4x1x128xi32>
    %199 = arith.cmpi eq, %177, %198 : vector<4x1x128xi32>
    %cst_71 = arith.constant 0.000000e+00 : f32
    %200 = vector.shape_cast %120 : vector<4x1x1xf32> to vector<4x1x1xf32>
    %201 = vector.broadcast %200 : vector<4x1x1xf32> to vector<4x1x128xf32>
    %202 = vector.broadcast %cst_71 : f32 to vector<4x1x128xf32>
    %203 = arith.select %199, %201, %202 : vector<4x1x128xi1>, vector<4x1x128xf32>
    %204 = arith.addf %197, %203 : vector<4x1x128xf32>
    %c4_i32 = arith.constant 4 : i32
    %205 = vector.broadcast %c4_i32 : i32 to vector<4x1x128xi32>
    %206 = arith.cmpi eq, %177, %205 : vector<4x1x128xi32>
    %cst_72 = arith.constant 0.000000e+00 : f32
    %207 = vector.shape_cast %128 : vector<4x1x1xf32> to vector<4x1x1xf32>
    %208 = vector.broadcast %207 : vector<4x1x1xf32> to vector<4x1x128xf32>
    %209 = vector.broadcast %cst_72 : f32 to vector<4x1x128xf32>
    %210 = arith.select %206, %208, %209 : vector<4x1x128xi1>, vector<4x1x128xf32>
    %211 = arith.addf %204, %210 : vector<4x1x128xf32>
    %c0_73 = arith.constant 0 : index
    %c0_74 = arith.constant 0 : index
    %c0_75 = arith.constant 0 : index
    %212 = vector.load %arg5[%c0_73, %c0_74, %c0_75] : memref<4x1x128xf32, #tpu.memory_space<vmem>>, vector<4x1x128xf32>
    tpu.vector_store %arg5[%c0_73, %c0_74, %c0_75], %211 {strides = array<i32>} : memref<4x1x128xf32, #tpu.memory_space<vmem>>, vector<4x1x128xf32>,
    return
  }
  func.func @transform_0(%arg0: i32) -> (i32, i32, i32) {
    %c0_i32 = arith.constant 0 : i32
    %c0_i32_0 = arith.constant 0 : i32
    %c0_i32_1 = arith.constant 0 : i32
    return %arg0, %c0_i32, %c0_i32_0 : i32, i32, i32
  }
  func.func @transform_1(%arg0: i32) -> (i32, i32, i32) {
    %c0_i32 = arith.constant 0 : i32
    %c0_i32_0 = arith.constant 0 : i32
    %c0_i32_1 = arith.constant 0 : i32
    return %arg0, %c0_i32, %c0_i32_0 : i32, i32, i32
  }
  func.func @transform_2(%arg0: i32) -> (i32, i32) {
    %c0_i32 = arith.constant 0 : i32
    %c0_i32_0 = arith.constant 0 : i32
    %c0_i32_1 = arith.constant 0 : i32
    return %c0_i32, %c0_i32_0 : i32, i32
  }
  func.func @transform_3(%arg0: i32) -> (i32, i32) {
    %c0_i32 = arith.constant 0 : i32
    %c0_i32_0 = arith.constant 0 : i32
    %c0_i32_1 = arith.constant 0 : i32
    return %c0_i32, %c0_i32_0 : i32, i32
  }
  func.func @transform_4(%arg0: i32) -> (i32, i32, i32) {
    %c0_i32 = arith.constant 0 : i32
    %c0_i32_0 = arith.constant 0 : i32
    %c0_i32_1 = arith.constant 0 : i32
    return %arg0, %c0_i32, %c0_i32_0 : i32, i32, i32
  }
}

</mosaic_0001>

<bundles_post_ra>
// kernel: hybrid_e_loss.1
= control target key start
LH: loop header
LB: loop body
LE: loop exit
PB: predicated region body
PF: predicated region fallthrough
CT: control target
= control target key end

     0   :  { %s1616_s15 = smov 0   ;;  %s2389_s0 = inlined_call_operand.vmem [shape: f32[8,16,128], index: 0, kind: input, shape index: {}]   ;;  %s2390_s1 = inlined_call_operand.vmem [shape: f32[8,16,128], index: 1, kind: input, shape index: {}]   ;;  %s2391_s2 = inlined_call_operand.vmem [shape: f32[16,16], index: 2, kind: input, shape index: {}]   ;;  %s2392_s3 = inlined_call_operand.vmem [shape: f32[128,128], index: 3, kind: input, shape index: {}]   ;;  %s2393_s4 = inlined_call_operand.vmem [shape: f32[8,1,128], index: 4, kind: output, shape index: {}]  }
   0x1 LB: > { %s1441_s16 = sadd.s32 4294967295, %s1588_s15   ;;  %p1445_p0 = scmp.ge.s32.totalorder %s1588_s15, 1  ;;  %s1588_s15 = sphi %s1616_s15, %s14_s15  }
   0x2   : > { %p176_p1 = scmp.lt.s32.totalorder %s1588_s15, 3 }
   0x4   : > { %p177_p2 = pnand %p1445_p0, %p176_p1 }
   0x5   : > { %s1446_s21 = sshll.u32 (!%p177_p2), %s1441_s16, 2 }
   0x6   : > { %180 = sbr.rel (%p177_p2) target bundleno = 518 (0x206), region = 36  ;;  %p209_p3 = scmp.lt.s32.totalorder (!%p177_p2), %s1446_s21, 7 }
   0xb   : > { %v260_v0 = vld [vmem:[%s2392_s3 + $0x78] sm:$0xff]  ;;  %v259_v1 = vld [vmem:[%s2392_s3 + $0x70] sm:$0xff]  ;;  %v695_v2 = vlaneseq  ;;  %v258_v3 = vld [vmem:[%s2392_s3 + $0x68] sm:$0xff]  ;;  %s2431_s21 = smov (!%p209_p3, %s1446_s21), 7  ;;  %v1590_v6 = vmov 0.0  }
   0xc   : > { %261 = vmatpush.msra.mxu0 %v260_v0  ;;  %1467 = vmatpush.msra.mxu2 %v260_v0  ;;  %v257_v5 = vld [vmem:[%s2392_s3 + $0x60] sm:$0xff]  ;;  %s1465_s26 = sshll.u32 %s2431_s21, 4  ;;  %v256_v8 = vld [vmem:[%s2392_s3 + $0x58] sm:$0xff]  ;;  %v255_v9 = vld [vmem:[%s2392_s3 + $0x50] sm:$0xff]  ;;  %s2346_s13 = scalar_lea.vmem %s2393_s4, %s2431_s21 }
   0xd   : > { %1468 = vmatpush.msra.mxu3 %v260_v0  ;;  %v1633_v4 = vand.u32 127, %v695_v2  ;;  %s1650_s5 = scalar_lea.vmem %s2390_s1, %s1465_s26  ;;  %s1655_s8 = scalar_lea.vmem %s2389_s0, %s1465_s26  ;;  %v254_v11 = vld [vmem:[%s2392_s3 + $0x48] sm:$0xff]  ;;  %v253_v27 = vld [vmem:[%s2392_s3 + $0x40] sm:$0xff]  ;;  %v252_v34 = vld [vmem:[%s2392_s3 + $0x38] sm:$0xff] }
   0xe   : > { %262 = vmatpush.msra.mxu0 %v259_v1  ;;  %1469 = vmatpush.msra.mxu2 %v259_v1  ;;  %v1661_v10 = vld [vmem:[%s1650_s5 + $0x18] sm:$0xff]  ;;  %v1669_v13 = vld [vmem:[%s1650_s5] sm:$0xff]  ;;  %v1672_v14 = vld [vmem:[%s1650_s5 + $0x8] sm:$0xff] }
   0xf   : > { %1470 = vmatpush.msra.mxu3 %v259_v1  ;;  %vm699_vm0 = vcmp.lt.s32.totalorder %v1633_v4, 16  ;;  %v1675_v15 = vld [vmem:[%s1650_s5 + $0x20] sm:$0xff]  ;;  %v1680_v17 = vld [vmem:[%s1655_s8 + $0x10] sm:$0xff]  ;;  %v1683_v18 = vld [vmem:[%s1655_s8 + $0x8] sm:$0xff] }
  0x10   : > { %263 = vmatpush.msra.mxu0 %v258_v3  ;;  %1471 = vmatpush.msra.mxu2 %v258_v3  ;;  %v1642_v7 = vsel %vm699_vm0, 1.0, %v1590_v6  ;;  %v462_v20 = vand.u32 2147483647, %v1680_v17  ;;  %v1689_v21 = vld [vmem:[%s1655_s8] sm:$0xff]  ;;  %v1692_v22 = vld [vmem:[%s1655_s8 + $0x18] sm:$0xff]  ;;  %v1705_v30 = vld [vmem:[%s1655_s8 + $0x28] sm:$0xff] }
  0x11   : > { %1472 = vmatpush.msra.mxu3 %v258_v3  ;;  %v1005_v12 = vmul.f32 %v1642_v7, %v1661_v10  ;;  %v1003_v16 = vmul.f32 %v1642_v7, %v1672_v14  ;;  %v1002_v19 = vmul.f32 %v1642_v7, %v1669_v13  ;;  %v1695_v23 = vld [vmem:[%s1655_s8 + $0x20] sm:$0xff]  ;;  %v461_v24 = vand.u32 2147483647, %v1683_v18  ;;  %v1711_v35 = vld [vmem:[%s1650_s5 + $0x28] sm:$0xff]  ;;  %v1717_v39 = vld [vmem:[%s1650_s5 + $0x10] sm:$0xff] }
  0x12   : > { %264 = vmatpush.msra.mxu0 %v257_v5  ;;  %1473 = vmatpush.msra.mxu2 %v257_v5  ;;  %v460_v25 = vand.u32 2147483647, %v1689_v21  ;;  %v463_v26 = vand.u32 2147483647, %v1692_v22  ;;  %v470_v28 = vsub.f32 0.0, %v462_v20  ;;  %v1006_v36 = vmul.f32 %v1642_v7, %v1675_v15  ;;  %v251_v43 = vld [vmem:[%s2392_s3 + $0x30] sm:$0xff] }
  0x13   : > { %1474 = vmatpush.msra.mxu3 %v257_v5  ;;  %1016 = vadd.xlane.f32.xlu1 %v1005_v12  ;;  %v464_v29 = vand.u32 2147483647, %v1695_v23  ;;  %v469_v31 = vsub.f32 0.0, %v461_v24  ;;  %v465_v38 = vand.u32 2147483647, %v1705_v30  ;;  %v1004_v44 = vmul.f32 %v1642_v7, %v1717_v39  ;;  %v250_v47 = vld [vmem:[%s2392_s3 + $0x28] sm:$0xff] }
  0x14   : > { %265 = vmatpush.msra.mxu0 %v256_v8  ;;  %1475 = vmatpush.msra.mxu2 %v256_v8  ;;  %v468_v32 = vsub.f32 0.0, %v460_v25  ;;  %v471_v33 = vsub.f32 0.0, %v463_v26  ;;  %v480_v37 = vmul.f32 1.442695, %v470_v28  ;;  %v1007_v48 = vmul.f32 %v1642_v7, %v1711_v35  ;;  %v249_v50 = vld [vmem:[%s2392_s3 + $0x20] sm:$0xff]  ;;  %v248_v53 = vld [vmem:[%s2392_s3 + $0x18] sm:$0xff] }
  0x15   : > { %1476 = vmatpush.msra.mxu3 %v256_v8  ;;  %1012 = vadd.xlane.f32.xlu0 %v1003_v16  ;;  %v478_v40 = vmul.f32 1.442695, %v469_v31  ;;  %v472_v42 = vsub.f32 0.0, %v464_v29  ;;  %v473_v46 = vsub.f32 0.0, %v465_v38  ;;  %v494_v54 = vmax.f32 %v1680_v17, 0.0  ;;  %v247_v61 = vld [vmem:[%s2392_s3 + $0x10] sm:$0xff] }
  0x16   : > { %266 = vmatpush.msra.mxu0 %v255_v9  ;;  %1477 = vmatpush.msra.mxu2 %v255_v9  ;;  %v476_v41 = vmul.f32 1.442695, %v468_v32  ;;  %1510 = vpow2.f32 %v480_v37  ;;  %v482_v45 = vmul.f32 1.442695, %v471_v33  ;;  %v502_v55 = vmul.f32 %v1717_v39, %v1680_v17  ;;  %v246_v1 = vld [vmem:[%s2392_s3 + $0x8] sm:$0xff]  ;;  %v245_v6 = vld [vmem:[%s2392_s3] sm:$0xff] }
  0x17   : > { %1478 = vmatpush.msra.mxu3 %v255_v9  ;;  %1010 = vadd.xlane.f32.xlu2 %v1002_v19  ;;  %1512 = vpow2.f32 %v478_v40  ;;  %v484_v49 = vmul.f32 1.442695, %v472_v42  ;;  %v486_v51 = vmul.f32 1.442695, %v473_v46  ;;  %v492_v58 = vmax.f32 %v1689_v21, 0.0 }
  0x18   : > { %267 = vmatpush.msra.mxu0 %v254_v11  ;;  %1479 = vmatpush.msra.mxu2 %v254_v11  ;;  %1514 = vpow2.f32 %v476_v41  ;;  %v500_v59 = vmul.f32 %v1669_v13, %v1689_v21  ;;  %v510_v2 = vsub.f32 %v494_v54, %v502_v55  ;;  %v493_v20 = vmax.f32 %v1683_v18, 0.0 }
  0x19   : > { %1480 = vmatpush.msra.mxu3 %v254_v11  ;;  %1516 = vpow2.f32 %v482_v45  ;;  %v501_v25 = vmul.f32 %v1672_v14, %v1683_v18  ;;  %vm669_vm8 = vcmp.ge.f32.partialorder %v1683_v18, 0.0  ;;  %vm668_vm12 = vcmp.ge.f32.partialorder %v1689_v21, 0.0 }
  0x1a   : > { %268 = vmatpush.msra.mxu0 %v253_v27  ;;  %1481 = vmatpush.msra.mxu2 %v253_v27  ;;  %1518 = vpow2.f32 %v484_v49  ;;  %v1768_v5 = vsub.f32 %v492_v58, %v500_v59  ;;  %vm670_vm15 = vcmp.ge.f32.partialorder %v1680_v17, 0.0 }
  0x1b   : > { %1482 = vmatpush.msra.mxu3 %v253_v27  ;;  %1018 = vadd.xlane.f32.xlu1 %v1006_v36  ;;  %1520 = vpow2.f32 %v486_v51  ;;  %v509_v46 = vsub.f32 %v493_v20, %v501_v25 }
  0x1c   : > { %269 = vmatpush.msra.mxu0 %v252_v34  ;;  %1483 = vmatpush.msra.mxu2 %v252_v34  ;;  %v1732_v52 = vpop.eup %1510 }
  0x1d   : > { %1484 = vmatpush.msra.mxu3 %v252_v34  ;;  %1014 = vadd.xlane.f32.xlu0 %v1004_v44  ;;  %v1740_v56 = vpop.eup %1512  ;;  %v1743_v57 = vadd.f32 1.0, %v1732_v52 }
  0x1e   : > { %270 = vmatpush.msra.mxu0 %v251_v43  ;;  %1485 = vmatpush.msra.mxu2 %v251_v43  ;;  %v1748_v60 = vpop.eup %1514  ;;  %v1754_v62 = vadd.f32 1.0, %v1740_v56 }
  0x1f   : > { %1486 = vmatpush.msra.mxu3 %v251_v43  ;;  %1020 = vadd.xlane.f32.xlu2 %v1007_v48  ;;  %v1756_v63 = vpop.eup %1516  ;;  %1522 = vlog2.f32 %v1743_v57  ;;  %v1760_v0 = vadd.f32 1.0, %v1748_v60  ;;  %v587_v19 = vand.u32 2147483647, %v1743_v57  ;;  %vm583_vm2 = vweird.f32 %v1743_v57 }
  0x20   : > { %271 = vmatpush.msra.mxu0 %v250_v47  ;;  %1487 = vmatpush.msra.mxu2 %v250_v47  ;;  %1524 = vrcp.f32 %v1743_v57  ;;  %v572_v3 = vand.u32 2147483647, %v1754_v62  ;;  %v574_v8 = vand.u32 2147483648, %v1754_v62  ;;  %v1777_v11 = vadd.f32 1.0, %v1756_v63  ;;  %v1779_v12 = vpop.eup %1518 }
  0x21   : > { %1488 = vmatpush.msra.mxu3 %v250_v47  ;;  %1526 = vrcp.f32 %v1754_v62  ;;  %v559_v9 = vand.u32 2147483648, %v1760_v0  ;;  %v557_v16 = vand.u32 2147483647, %v1760_v0  ;;  %v1785_v24 = vpop.eup %1520  ;;  %vm568_vm1 = vweird.f32 %v1754_v62 }
  0x22   : > { %272 = vmatpush.msra.mxu0 %v249_v50  ;;  %1489 = vmatpush.msra.mxu2 %v249_v50  ;;  %1528 = vrcp.f32 %v1760_v0  ;;  %vm553_vm3 = vweird.f32 %v1760_v0  ;;  %v602_v27 = vand.u32 2147483647, %v1777_v11  ;;  %v604_v28 = vand.u32 2147483648, %v1777_v11 }
  0x23   : > { %1490 = vmatpush.msra.mxu3 %v249_v50  ;;  %1530 = vlog2.f32 %v1760_v0  ;;  %vm1800_vm4 = vcmp.eq.f32.partialorder %v572_v3, 8.507059e+37  ;;  %v1804_v33 = vor.u32 1.1754944e-38, %v574_v8  ;;  %v1806_v34 = vor.u32 1.1754944e-38, %v559_v9 }
  0x24   : > { %273 = vmatpush.msra.mxu0 %v248_v53  ;;  %1491 = vmatpush.msra.mxu2 %v248_v53  ;;  %1532 = vrcp.f32 %v1777_v11  ;;  %v1809_v36 = vadd.f32 1.0, %v1779_v12  ;;  %vm1813_vm5 = vcmp.eq.f32.partialorder %v557_v16, 8.507059e+37  ;;  %vm598_vm6 = vweird.f32 %v1777_v11 }
  0x25   : > { %1492 = vmatpush.msra.mxu3 %v248_v53  ;;  %v1523_v26 = vpop.eup %1522  ;;  %1534 = vlog2.f32 %v1754_v62  ;;  %vm1820_vm7 = vcmp.eq.f32.partialorder %v587_v19, 8.507059e+37  ;;  %v589_v42 = vand.u32 2147483648, %v1743_v57  ;;  %vm1834_vm9 = vcmp.eq.f32.partialorder %v602_v27, 8.507059e+37  ;;  %v1857_v19 = vld [vmem:[%s1650_s5 + $0x30] sm:$0xff] }
  0x26   : > { %274 = vmatpush.msra.mxu0 %v247_v61  ;;  %1493 = vmatpush.msra.mxu2 %v247_v61  ;;  %v1796_v29 = vpop.eup %1524  ;;  %v529_v31 = vmul.f32 0.6931472, %v1523_v26  ;;  %1536 = vrcp.f32 %v1809_v36  ;;  %v605_v50 = vor.u32 1.1754944e-38, %v604_v28 }
  0x27   : > { %1494 = vmatpush.msra.mxu3 %v247_v61  ;;  %v1811_v37 = vpop.eup %1526  ;;  %v579_v40 = vmul.f32 %v1796_v29, %v1743_v57  ;;  %vm584_vm10 = vweird.f32 %v1796_v29  ;;  %v590_v9 = vor.u32 1.1754944e-38, %v589_v42 }
  0x28   : > { %275 = vmatpush.msra.mxu0 %v246_v1  ;;  %1495 = vmatpush.msra.mxu2 %v246_v1  ;;  %v1825_v43 = vpop.eup %1528  ;;  %v542_v44 = vadd.f32 %v529_v31, %v510_v2  ;;  %v564_v45 = vmul.f32 %v1811_v37, %v1754_v62  ;;  %vm569_vm11 = vweird.f32 %v1811_v37  ;;  %vm1851_vm14 = vmor %vm583_vm2, %vm584_vm10  ;;  %vm671_vm10 = vcmp.ge.f32.partialorder %v1692_v22, 0.0 }
  0x29   : > { %1496 = vmatpush.msra.mxu3 %v246_v1  ;;  %v1531_v47 = vpop.eup %1530  ;;  %v549_v48 = vmul.f32 %v1825_v43, %v1760_v0  ;;  %v580_v51 = vsub.f32 1.0, %v579_v40  ;;  %vm554_vm13 = vweird.f32 %v1825_v43  ;;  %vm1863_vm0 = vmor %vm568_vm1, %vm569_vm11  ;;  %vm613_vm11 = vweird.f32 %v1809_v36 }
  0x2a   : > { %276 = vmatpush.msra.mxu0 %v245_v6  ;;  %1497 = vmatpush.msra.mxu2 %v245_v6  ;;  %v1533_v53 = vpop.eup %1532  ;;  %v708_v54 = vmul.f32 %v1642_v7, %v542_v44  ;;  %v565_v55 = vsub.f32 1.0, %v564_v45  ;;  %v525_v58 = vmul.f32 0.6931472, %v1531_v47  ;;  %vm1877_vm1 = vmor %vm553_vm3, %vm554_vm13  ;;  %v1884_v31 = vadd.f32 1.0, %v1785_v24 }
  0x2b   : > { %277 = vmatmul.f32.vlgmr.msra.gmra.mxu0 %v1669_v13  ;;  %286 = vmatmul.f32.vlgmr.msra.gmra.mxu2 %v1661_v10  ;;  %v1535_v59 = vpop.eup %1534  ;;  %v550_v61 = vsub.f32 1.0, %v549_v48  ;;  %v594_v1 = vmul.f32 %v1533_v53, %v1777_v11  ;;  %v581_v2 = vmul.f32 %v1796_v29, %v580_v51  ;;  %vm599_vm2 = vweird.f32 %v1533_v53 }
  0x2c   : > { %1498 = vmatpush.msra.mxu3 %v245_v6  ;;  %718 = vadd.xlane.f32.xlu1 %v708_v54  ;;  %v566_v3 = vmul.f32 %v1811_v37, %v565_v55  ;;  %v540_v6 = vadd.f32 %v525_v58, %v1768_v5  ;;  %v527_v16 = vmul.f32 0.6931472, %v1535_v59  ;;  %v1537_v26 = vpop.eup %1536  ;;  %vm1898_vm3 = vmor %vm598_vm6, %vm599_vm2  ;;  %v617_v51 = vand.u32 2147483647, %v1809_v36 }
  0x2d   : > { %292 = vmatmul.f32.vlgmr.msra.gmra.mxu3 %v1711_v35  ;;  %v551_v57 = vmul.f32 %v1825_v43, %v550_v61  ;;  %v595_v20 = vsub.f32 1.0, %v594_v1  ;;  %v582_v25 = vadd.f32 %v1796_v29, %v581_v2  ;;  %v609_v0 = vmul.f32 %v1537_v26, %v1809_v36  ;;  %v1929_v1 = vld [vmem:[%s1655_s8 + $0x38] sm:$0xff] }
  0x2e   : > { %v567_v27 = vadd.f32 %v1811_v37, %v566_v3  ;;  %v706_v28 = vmul.f32 %v1642_v7, %v540_v6  ;;  %v619_v58 = vand.u32 2147483648, %v1809_v36  ;;  %vm614_vm6 = vweird.f32 %v1537_v26  ;;  %v1951_v6 = vld [vmem:[%s1655_s8 + $0x30] sm:$0xff] }
  0x2f   : > { %v552_v40 = vadd.f32 %v1825_v43, %v551_v57  ;;  %v596_v42 = vmul.f32 %v1533_v53, %v595_v20  ;;  %v586_v44 = vsel %vm1851_vm14, %v1796_v29, %v582_v25  ;;  %v541_v29 = vadd.f32 %v527_v16, %v509_v46 }
  0x30   : > { %v571_v45 = vsel %vm1863_vm0, %v1811_v37, %v567_v27  ;;  %714 = vadd.xlane.f32.xlu0 %v706_v28  ;;  %v591_v48 = vsel %vm1820_vm7, %v590_v9, %v586_v44  ;;  %v610_v46 = vsub.f32 1.0, %v609_v0  ;;  %1538 = vrcp.f32 %v1884_v31 }
  0x31   : > { %v576_v54 = vsel %vm1800_vm4, %v1804_v33, %v571_v45  ;;  %v556_v37 = vsel %vm1877_vm1, %v1825_v43, %v552_v40  ;;  %v597_v55 = vadd.f32 %v1533_v53, %v596_v42  ;;  %v678_v61 = vmul.f32 %v1732_v52, %v591_v48  ;;  %vm1943_vm4 = vmor %vm613_vm11, %vm614_vm6 }
  0x32   : > { %v677_v59 = vmul.f32 %v1740_v56, %v576_v54  ;;  %v561_v41 = vsel %vm1813_vm5, %v1806_v34, %v556_v37  ;;  %v707_v34 = vmul.f32 %v1642_v7, %v541_v29  ;;  %v611_v38 = vmul.f32 %v1537_v26, %v610_v46 }
  0x33   : > { %280 = vmatmul.f32.gmra.mxu0 %v1672_v14  ;;  %289 = vmatmul.f32.gmra.mxu2 %v1675_v15  ;;  %v676_v32 = vmul.f32 %v1748_v60, %v561_v41  ;;  %v601_v33 = vsel %vm1898_vm3, %v1533_v53, %v597_v55  ;;  %v1932_v60 = vld [vmem:[%s1650_s5 + $0x38] sm:$0xff]  ;;  %vm618_vm5 = vcmp.eq.f32.partialorder %v617_v51, 8.507059e+37  ;;  %v1955_v21 = vsel %vm670_vm15, %v591_v48, %v678_v61 }
  0x34   : > { %v1923_v43 = vsel %vm669_vm8, %v576_v54, %v677_v59  ;;  %v606_v56 = vsel %vm1834_vm9, %v605_v50, %v601_v33  ;;  %v620_v50 = vor.u32 1.1754944e-38, %v619_v58  ;;  %v612_v3 = vadd.f32 %v1537_v26, %v611_v38 }
  0x35   : > { %295 = vmatmul.f32.gmra.mxu3 %v1857_v19  ;;  %v947_v52 = vmul.f32 %v1642_v7, %v1923_v43  ;;  %v1938_v53 = vsel %vm668_vm12, %v561_v41, %v676_v32  ;;  %v679_v18 = vmul.f32 %v1756_v63, %v606_v56  ;;  %v467_v63 = vand.u32 2147483647, %v1929_v1 }
  0x36   : > { %v946_v2 = vmul.f32 %v1642_v7, %v1938_v53  ;;  %v616_v9 = vsel %vm1943_vm4, %v1537_v26, %v612_v3  ;;  %v1539_v16 = vpop.eup %1538  ;;  %v466_v17 = vand.u32 2147483647, %v1951_v6  ;;  %v948_v20 = vmul.f32 %v1642_v7, %v1955_v21 }
  0x37   : > { %956 = vadd.xlane.f32.xlu2 %v947_v52  ;;  %v1961_v8 = vsel %vm671_vm10, %v606_v56, %v679_v18  ;;  %v621_v5 = vsel %vm618_vm5, %v620_v50, %v616_v9  ;;  %v475_v57 = vsub.f32 0.0, %v467_v63  ;;  %v624_v25 = vmul.f32 %v1539_v16, %v1884_v31 }
  0x38   : > { %954 = vadd.xlane.f32.xlu1 %v946_v2  ;;  %716 = vadd.xlane.f32.xlu0 %v707_v34  ;;  %vm628_vm7 = vweird.f32 %v1884_v31  ;;  %v949_v27 = vmul.f32 %v1642_v7, %v1961_v8  ;;  %v634_v62 = vand.u32 2147483648, %v1884_v31  ;;  %v474_v26 = vsub.f32 0.0, %v466_v17 }
  0x39   : > { %v490_v28 = vmul.f32 1.442695, %v475_v57  ;;  %v680_v40 = vmul.f32 %v1779_v12, %v621_v5  ;;  %v625_v42 = vsub.f32 1.0, %v624_v25  ;;  %vm629_vm8 = vweird.f32 %v1539_v16 }
  0x3a   : > { %v632_v44 = vand.u32 2147483647, %v1884_v31  ;;  %vm672_vm9 = vcmp.ge.f32.partialorder %v1695_v23, 0.0  ;;  %v488_v0 = vmul.f32 1.442695, %v474_v26  ;;  %vm630_vm12 = vmor %vm628_vm7, %vm629_vm8  ;;  %v635_v47 = vor.u32 1.1754944e-38, %v634_v62 }
  0x3b   : > { %283 = vmatmul.f32.gmra.mxu0 %v1717_v39  ;;  %1540 = vpow2.f32 %v490_v28  ;;  %v626_v45 = vmul.f32 %v1539_v16, %v625_v42  ;;  %v1976_v48 = vsel %vm672_vm9, %v621_v5, %v680_v40  ;;  %vm673_vm14 = vcmp.ge.f32.partialorder %v1705_v30, 0.0 }
  0x3c   : > { %1542 = vpow2.f32 %v488_v0  ;;  %vm633_vm13 = vcmp.eq.f32.partialorder %v632_v44, 8.507059e+37  ;;  %v950_v54 = vmul.f32 %v1642_v7, %v1976_v48  ;;  %v1008_v33 = vmul.f32 %v1642_v7, %v1857_v19 }
  0x3d   : > { %298 = vmatmul.f32.gmra.mxu3 %v1932_v60  ;;  %v627_v29 = vadd.f32 %v1539_v16, %v626_v45  ;;  %v495_v5 = vmax.f32 %v1692_v22, 0.0  ;;  %v503_v57 = vmul.f32 %v1661_v10, %v1692_v22  ;;  %vm675_vm6 = vcmp.ge.f32.partialorder %v1929_v1, 0.0 }
  0x3e   : > { %vm674_vm5 = vcmp.ge.f32.partialorder %v1951_v6, 0.0  ;;  %vm302_vm7 = vcmask 130048  }
  0x3f   : > { %960 = vadd.xlane.f32.xlu2 %v949_v27  ;;  %v631_v51 = vsel %vm630_vm12, %v1539_v16, %v627_v29  ;;  %v511_v26 = vsub.f32 %v495_v5, %v503_v57 }
  0x40   : > { %958 = vadd.xlane.f32.xlu1 %v948_v20  ;;  %v636_v37 = vsel %vm633_vm13, %v635_v47, %v631_v51 }
  0x41   : > { %v1541_v12 = vpop.eup %1540  ;;  %v681_v55 = vmul.f32 %v1785_v24, %v636_v37 }
  0x42   : > { %v1982_v58 = vadd.f32 1.0, %v1541_v12  ;;  %v1543_v59 = vpop.eup %1542 }
  0x43   : > { %v1984_v41 = vsel %vm673_vm14, %v636_v37, %v681_v55  ;;  %v1989_v32 = vadd.f32 1.0, %v1543_v59 }
  0x44   : > { %1544 = vrcp.f32 %v1982_v58  ;;  %v951_v46 = vmul.f32 %v1642_v7, %v1984_v41  ;;  %v664_v56 = vand.u32 2147483648, %v1982_v58  ;;  %vm658_vm15 = vweird.f32 %v1982_v58 }
  0x45   : > { %1546 = vrcp.f32 %v1989_v32  ;;  %v662_v52 = vand.u32 2147483647, %v1982_v58  ;;  %v649_v2 = vand.u32 2147483648, %v1989_v32  ;;  %vm643_vm10 = vweird.f32 %v1989_v32 }
  0x46   : > { %964 = vadd.xlane.f32.xlu0 %v951_v46  ;;  %1548 = vlog2.f32 %v1777_v11  ;;  %v665_v50 = vor.u32 1.1754944e-38, %v664_v56  ;;  %v647_v11 = vand.u32 2147483647, %v1989_v32 }
  0x47   : > { %962 = vadd.xlane.f32.xlu2 %v950_v54  ;;  %vm663_vm11 = vcmp.eq.f32.partialorder %v662_v52, 8.507059e+37  ;;  %v650_v20 = vor.u32 1.1754944e-38, %v649_v2  ;;  %1550 = vlog2.f32 %v1809_v36  ;;  %v2040_v36 = vld [vmem:[%s2391_s2 + $0x8] sm:$0xff] }
  0x48   : > { %vm648_vm4 = vcmp.eq.f32.partialorder %v647_v11, 8.507059e+37  ;;  %1552 = vlog2.f32 %v1989_v32 }
  0x49   : > { %1554 = vlog2.f32 %v1982_v58 }
  0x4a   : > { %v1545_v24 = vpop.eup %1544  ;;  %1556 = vlog2.f32 %v1884_v31 }
  0x4b   : > { %v654_v61 = vmul.f32 %v1545_v24, %v1982_v58  ;;  %v1547_v34 = vpop.eup %1546  ;;  %vm659_vm0 = vweird.f32 %v1545_v24 }
  0x4c   : > { %v639_v18 = vmul.f32 %v1547_v34, %v1989_v32  ;;  %vm660_vm2 = vmor %vm658_vm15, %vm659_vm0  ;;  %vm644_vm1 = vweird.f32 %v1547_v34  ;;  %v1549_v9 = vpop.eup %1548  ;;  %v496_v32 = vmax.f32 %v1695_v23, 0.0 }
  0x4d   : > { %v655_v38 = vsub.f32 1.0, %v654_v61  ;;  %vm645_vm3 = vmor %vm643_vm10, %vm644_vm1  ;;  %v531_v40 = vmul.f32 0.6931472, %v1549_v9 }
  0x4e   : > { %v640_v3 = vsub.f32 1.0, %v639_v18 }
  0x4f   : > { %1022 = vadd.xlane.f32.xlu2 %v1008_v33  ;;  %v656_v49 = vmul.f32 %v1545_v24, %v655_v38  ;;  %v543_v47 = vadd.f32 %v531_v40, %v511_v26  ;;  %v2024_v40 = vld [vmem:[%s2391_s2] sm:$0xff] }
  0x50   : > { %v641_v16 = vmul.f32 %v1547_v34, %v640_v3 }
  0x51   : > { %v657_v63 = vadd.f32 %v1545_v24, %v656_v49  ;;  %v709_v51 = vmul.f32 %v1642_v7, %v543_v47 }
  0x52   : > { %v642_v27 = vadd.f32 %v1547_v34, %v641_v16 }
  0x53   : > { %v661_v17 = vsel %vm660_vm2, %v1545_v24, %v657_v63 }
  0x54   : > { %v666_v25 = vsel %vm663_vm11, %v665_v50, %v661_v17  ;;  %v646_v28 = vsel %vm645_vm3, %v1547_v34, %v642_v27 }
  0x55   : > { %v683_v62 = vmul.f32 %v1541_v12, %v666_v25  ;;  %v651_v44 = vsel %vm648_vm4, %v650_v20, %v646_v28  ;;  %v1009_v12 = vmul.f32 %v1642_v7, %v1932_v60 }
  0x56   : > { %v682_v0 = vmul.f32 %v1543_v59, %v651_v44 }
  0x57   : > { %v2007_v42 = vsel %vm675_vm6, %v666_v25, %v683_v62 }
  0x58   : > { %v953_v22 = vmul.f32 %v1642_v7, %v2007_v42  ;;  %v2012_v45 = vsel %vm674_vm5, %v651_v44, %v682_v0 }
  0x59   : > { %v952_v29 = vmul.f32 %v1642_v7, %v2012_v45 }
  0x5a   : > { %968 = vadd.xlane.f32.xlu1 %v953_v22 }
  0x5b   : > { %966 = vadd.xlane.f32.xlu0 %v952_v29 }
  0x62   : > { %720 = vadd.xlane.f32.xlu1 %v709_v51 }
  0x63   : > { %1024 = vadd.xlane.f32.xlu0 %v1009_v12 }
  0x86   : > { %v1017_v37 = vpop.xlane.xlu1 %1016 }
  0x88   : > { %v1013_v54 = vpop.xlane.xlu0 %1012 }
  0x8a   : > { %v1011_v55 = vpop.xlane.xlu2 %1010 }
  0x8b   : > { %v1026_v46 = vadd.f32 %v1013_v54, %v1011_v55 }
  0x8d   : > { %v1027_v59 = vrot.slane %v1026_v46, 4 }
  0x8e   : > { %v1019_v24 = vpop.xlane.xlu1 %1018 }
  0x8f   : > { %v1028_v56 = vadd.f32 %v1027_v59, %v1026_v46 }
  0x90   : > { %v1015_v33 = vpop.xlane.xlu0 %1014 }
  0x91   : > { %v1033_v61 = vadd.f32 %v1017_v37, %v1015_v33  ;;  %v1029_v18 = vrot.slane %v1028_v56, 2 }
  0x92   : > { %v1021_v38 = vpop.xlane.xlu2 %1020 }
  0x93   : > { %v1034_v34 = vrot.slane %v1033_v61, 4  ;;  %v1040_v52 = vadd.f32 %v1021_v38, %v1019_v24  ;;  %v1030_v3 = vadd.f32 %v1029_v18, %v1028_v56  ;;  %v504_v38 = vmul.f32 %v1675_v15, %v1695_v23 }
  0x95   : > { %v1035_v49 = vadd.f32 %v1034_v34, %v1033_v61  ;;  %v1041_v50 = vrot.slane %v1040_v52, 4  ;;  %v1031_v5 = vrot.slane %v1030_v3, 1 }
  0x97   : > { %v1036_v9 = vrot.slane %v1035_v49, 2  ;;  %v1042_v16 = vadd.f32 %v1041_v50, %v1040_v52  ;;  %v1032_v27 = vadd.f32 %v1031_v5, %v1030_v3  ;;  %v1551_v52 = vpop.eup %1550  ;;  %v506_v3 = vmul.f32 %v1857_v19, %v1951_v6 }
  0x98   : > { %v533_v23 = vmul.f32 0.6931472, %v1551_v52 }
  0x99   : > { %v1037_v57 = vadd.f32 %v1036_v9, %v1035_v49  ;;  %v1043_v20 = vrot.slane %v1042_v16, 2  ;;  %v1054_v51 = vmul.f32 0.00390625, %v1032_v27 }
  0x9b   : > { %v1038_v26 = vrot.slane %v1037_v57, 1  ;;  %v1044_v47 = vadd.f32 %v1043_v20, %v1042_v16  ;;  %v2033_v59 = vsub.f32 %v1669_v13, %v1054_v51  ;;  %v498_v13 = vmax.f32 %v1951_v6, 0.0 }
  0x9c   : > { %v512_v16 = vsub.f32 %v496_v32, %v504_v38 }
  0x9d   : > { %v1039_v54 = vadd.f32 %v1038_v26, %v1037_v57  ;;  %v1045_v55 = vrot.slane %v1044_v47, 1 }
  0x9e   : > { %v544_v27 = vadd.f32 %v533_v23, %v512_v16 }
  0x9f   : > { %v2019_v2 = vpop.xlane.xlu1 %718  ;;  %v1055_v56 = vmul.f32 0.00390625, %v1039_v54  ;;  %v1046_v9 = vadd.f32 %v1045_v55, %v1044_v47  ;;  %v499_v54 = vmax.f32 %v1929_v1, 0.0 }
  0xa1   : > { %v2063_v26 = vsub.f32 %v1661_v10, %v1055_v56  ;;  %v507_v10 = vmul.f32 %v1932_v60, %v1929_v1  ;;  %v505_v1 = vmul.f32 %v1711_v35, %v1705_v30 }
  0xa3   : > { %v715_v63 = vpop.xlane.xlu0 %714  ;;  %v1109_v32 = vmul.f32 %v2063_v26, %v2063_v26 }
  0xa8   : > { %v278_v11 = vpop.f32.mrf.mxu0 }
  0xaa   : > { %v957_v25 = vpop.xlane.xlu2 %956 }
  0xab   : > { %v955_v44 = vpop.xlane.xlu1 %954  ;;  %v717_v0 = vpop.xlane.xlu0 %716 }
  0xac   : > { %v970_v22 = vadd.f32 %v957_v25, %v955_v44  ;;  %v2026_v29 = vadd.f32 %v717_v0, %v715_v63  ;;  %v2051_v63 = vsub.f32 %v1672_v14, %v1054_v51  ;;  %v2056_v25 = vsub.f32 %v1717_v39, %v1055_v56 }
  0xad   : > { %v1056_v44 = vmul.f32 0.00390625, %v1046_v9  ;;  %v710_v39 = vmul.f32 %v1642_v7, %v544_v27 }
  0xae   : > { %v287_v17 = vpop.f32.mrf.mxu2  ;;  %v971_v12 = vrot.slane %v970_v22, 4  ;;  %v1107_v0 = vmul.f32 %v2051_v63, %v2051_v63  ;;  %v1108_v31 = vmul.f32 %v2056_v25, %v2056_v25 }
  0xaf   : > { %1499 = vmatpush.msrb.mxu2 %v287_v17  ;;  %722 = vadd.xlane.f32.xlu2 %v710_v39  ;;  %v2080_v38 = vsub.f32 %v1675_v15, %v1056_v44 }
  0xb0   : > { %v281_v62 = vpop.f32.mrf.mxu0  ;;  %v293_v28 = vpop.f32.mrf.mxu3  ;;  %v972_v37 = vadd.f32 %v971_v12, %v970_v22 }
  0xb1   : > { %323 = vmatpush.msra.mxu1 %v281_v62 }
  0xb2   : > { %v961_v46 = vpop.xlane.xlu2 %960  ;;  %v973_v33 = vrot.slane %v972_v37, 2 }
  0xb3   : > { %324 = vmatpush.msra.mxu1 %v278_v11  ;;  %v959_v34 = vpop.xlane.xlu1 %958  ;;  %v1553_v11 = vpop.eup %1552 }
  0xb4   : > { %1453 = vmatmul.msk.f32.vlgmr.msra.gmra.mxu1 %vm302_vm7, %v2024_v40  ;;  %v974_v18 = vadd.f32 %v973_v33, %v972_v37  ;;  %v977_v49 = vadd.f32 %v961_v46, %v959_v34  ;;  %v537_v20 = vmul.f32 0.6931472, %v1553_v11  ;;  %v497_v37 = vmax.f32 %v1705_v30, 0.0  ;;  %v1555_v34 = vpop.eup %1554 }
  0xb5   : > { %358 = vmatpush.msrb.mxu1 %v287_v17  ;;  %v514_v17 = vsub.f32 %v498_v13, %v506_v3  ;;  %v515_v13 = vsub.f32 %v499_v54, %v507_v10  ;;  %v1557_v52 = vpop.eup %1556  ;;  %v539_v11 = vmul.f32 0.6931472, %v1555_v34 }
  0xb6   : > { %v290_v50 = vpop.f32.mrf.mxu2  ;;  %v975_v5 = vrot.slane %v974_v18, 1  ;;  %v978_v57 = vrot.slane %v977_v49, 4  ;;  %v513_v16 = vsub.f32 %v497_v37, %v505_v1  ;;  %v535_v23 = vmul.f32 0.6931472, %v1557_v52 }
  0xb7   : > { %v546_v62 = vadd.f32 %v537_v20, %v514_v17  ;;  %v2087_v20 = vsub.f32 %v1711_v35, %v1056_v44  ;;  %v547_v30 = vadd.f32 %v539_v11, %v515_v13 }
  0xb8   : > { %v284_v24 = vpop.f32.mrf.mxu0  ;;  %v2035_v61 = vpop.f32.mrf.mxu3  ;;  %v976_v6 = vadd.f32 %v975_v5, %v974_v18  ;;  %v979_v14 = vadd.f32 %v978_v57, %v977_v49  ;;  %v545_v27 = vadd.f32 %v535_v23, %v513_v16 }
  0xb9   : > { %359 = vmatpush.msrb.mxu1 %v284_v24  ;;  %1500 = vmatpush.msrb.mxu2 %v284_v24  ;;  %v712_v51 = vmul.f32 %v1642_v7, %v546_v62  ;;  %v965_v12 = vpop.xlane.xlu0 %964 }
  0xba   : > { %1456 = vmatmul.msk.f32.vlgmr.msrb.gmra.mxu2 %vm302_vm7, %v2040_v36  ;;  %v963_v22 = vpop.xlane.xlu2 %962  ;;  %v998_v47 = vmul.f32 0.00390625, %v976_v6  ;;  %v980_v58 = vrot.slane %v979_v14, 2 }
  0xbb   : > { %394 = vmatpush.msra.mxu1 %v293_v28  ;;  %v1106_v28 = vmul.f32 %v2033_v59, %v2033_v59  ;;  %v984_v56 = vadd.f32 %v965_v12, %v963_v22  ;;  %726 = vadd.xlane.f32.xlu1 %v712_v51 }
  0xbc   : > { %1454 = vmatmul.msk.f32.gmra.mxu1 %vm302_vm7, %v2040_v36  ;;  %v1058_v55 = vsub.f32 %v1938_v53, %v998_v47  ;;  %v1059_v46 = vsub.f32 %v1923_v43, %v998_v47  ;;  %v981_v33 = vadd.f32 %v980_v58, %v979_v14  ;;  %v713_v47 = vmul.f32 %v1642_v7, %v547_v30 }
  0xbd   : > { %395 = vmatpush.msra.mxu1 %v290_v50  ;;  %v985_v3 = vrot.slane %v984_v56, 4 }
  0xbe   : > { %v1098_v18 = vmul.f32 %v1058_v55, %v1058_v55  ;;  %v1099_v49 = vmul.f32 %v1059_v46, %v1059_v46  ;;  %v982_v50 = vrot.slane %v981_v33, 1  ;;  %v1074_v9 = vmul.f32 2.0, %v1058_v55  ;;  %728 = vadd.xlane.f32.xlu2 %v713_v47 }
  0xbf   : > { %v986_v17 = vadd.f32 %v985_v3, %v984_v56  ;;  %v1075_v6 = vmul.f32 2.0, %v1059_v46 }
  0xc0   : > { %v299_v24 = vpop.f32.mrf.mxu3  ;;  %v1114_v5 = vadd.f32 %v1106_v28, %v1098_v18  ;;  %v1115_v15 = vadd.f32 %v1107_v0, %v1099_v49  ;;  %v983_v57 = vadd.f32 %v982_v50, %v981_v33  ;;  %v1082_v28 = vmul.f32 %v1074_v9, %v2033_v59 }
  0xc1   : > { %v987_v39 = vrot.slane %v986_v17, 2  ;;  %v711_v0 = vmul.f32 %v1642_v7, %v545_v27  ;;  %v1083_v58 = vmul.f32 %v1075_v6, %v2051_v63  ;;  %v1110_v59 = vmul.f32 %v2080_v38, %v2080_v38 }
  0xc2   : > { %v1122_v14 = vadd.f32 1e-08, %v1114_v5  ;;  %v2090_v62 = vadd.f32 1e-08, %v1115_v15  ;;  %v999_v22 = vmul.f32 0.00390625, %v983_v57  ;;  %v1111_v63 = vmul.f32 %v2087_v20, %v2087_v20 }
  0xc3   : > { %v988_v44 = vadd.f32 %v987_v39, %v986_v17  ;;  %724 = vadd.xlane.f32.xlu0 %v711_v0  ;;  %v2105_v55 = vadd.f32 1e-08, %v1082_v28  ;;  %v2107_v56 = vadd.f32 1e-08, %v1083_v58 }
  0xc4   : > { %1455 = vmatmul.msk.f32.vlgmr.msrb.gmra.mxu1 %vm302_vm7, %v2024_v40  ;;  %1558 = vrcp.f32 %v1122_v14  ;;  %v1060_v35 = vsub.f32 %v1955_v21, %v999_v22  ;;  %v1139_v51 = vand.u32 2147483647, %v1122_v14  ;;  %v1141_v12 = vand.u32 2147483648, %v1122_v14 }
  0xc5   : > { %430 = vmatpush.msrb.mxu1 %v299_v24  ;;  %1560 = vrcp.f32 %v2090_v62  ;;  %v989_v37 = vrot.slane %v988_v44, 1  ;;  %vm1135_vm8 = vweird.f32 %v1122_v14  ;;  %vm1150_vm12 = vweird.f32 %v2090_v62 }
  0xc6   : > { %v1100_v54 = vmul.f32 %v1060_v35, %v1060_v35  ;;  %vm2109_vm9 = vcmp.eq.f32.partialorder %v1139_v51, 8.507059e+37  ;;  %v1142_v13 = vor.u32 1.1754944e-38, %v1141_v12  ;;  %v1076_v52 = vmul.f32 2.0, %v1060_v35 }
  0xc7   : > { %431 = vmatpush.msrb.mxu1 %v2035_v61  ;;  %v1061_v61 = vsub.f32 %v1961_v8, %v999_v22  ;;  %v990_v24 = vadd.f32 %v989_v37, %v988_v44  ;;  %v1154_v11 = vand.u32 2147483647, %v2090_v62  ;;  %v1156_v9 = vand.u32 2147483648, %v2090_v62 }
  0xc8   : > { %v1116_v46 = vadd.f32 %v1108_v31, %v1100_v54  ;;  %v1084_v17 = vmul.f32 %v1076_v52, %v2056_v25 }
  0xc9   : > { %v1101_v10 = vmul.f32 %v1061_v61, %v1061_v61  ;;  %v1077_v1 = vmul.f32 2.0, %v1061_v61  ;;  %v1000_v3 = vmul.f32 0.00390625, %v990_v24  ;;  %vm2137_vm15 = vcmp.eq.f32.partialorder %v1154_v11, 8.507059e+37 }
  0xca   : > { %v1559_v18 = vpop.eup %1558  ;;  %v2113_v49 = vadd.f32 1e-08, %v1116_v46  ;;  %v1157_v47 = vor.u32 1.1754944e-38, %v1156_v9  ;;  %v2157_v54 = vadd.f32 1e-08, %v1084_v17 }
  0xcb   : > { %v1117_v33 = vadd.f32 %v1109_v32, %v1101_v10  ;;  %v1561_v31 = vpop.eup %1560  ;;  %v1131_v32 = vmul.f32 %v1559_v18, %v1122_v14  ;;  %v1085_v16 = vmul.f32 %v1077_v1, %v2063_v26  ;;  %v2123_v23 = vsub.f32 %v1976_v48, %v1000_v3 }
  0xcc   : > { %1457 = vmatmul.msk.f32.vlgmr.msra.gmra.mxu1 %vm302_vm7, %v2024_v40  ;;  %1562 = vrcp.f32 %v2113_v49  ;;  %v2126_v5 = vsub.f32 %v1984_v41, %v1000_v3  ;;  %v1146_v15 = vmul.f32 %v1561_v31, %v2090_v62  ;;  %vm1136_vm13 = vweird.f32 %v1559_v18 }
  0xcd   : > { %v2115_v50 = vadd.f32 1e-08, %v1117_v33  ;;  %v1132_v57 = vsub.f32 1.0, %v1131_v32  ;;  %v1102_v30 = vmul.f32 %v2123_v23, %v2123_v23  ;;  %v969_v27 = vpop.xlane.xlu1 %968  ;;  %vm1151_vm14 = vweird.f32 %v1561_v31  ;;  %vm2143_vm0 = vmor %vm1135_vm8, %vm1136_vm13 }
  0xce   : > { %v1103_v26 = vmul.f32 %v2126_v5, %v2126_v5  ;;  %v1147_v6 = vsub.f32 1.0, %v1146_v15  ;;  %v2147_v35 = vadd.f32 1e-08, %v1085_v16  ;;  %v967_v44 = vpop.xlane.xlu0 %966  ;;  %vm2152_vm10 = vmor %vm1150_vm12, %vm1151_vm14  ;;  %vm1165_vm1 = vweird.f32 %v2113_v49 }
  0xcf   : > { %1564 = vrcp.f32 %v2115_v50  ;;  %v1133_v22 = vmul.f32 %v1559_v18, %v1132_v57  ;;  %v1186_v25 = vand.u32 2147483648, %v2115_v50  ;;  %vm1180_vm2 = vweird.f32 %v2115_v50  ;;  %v1023_v57 = vpop.xlane.xlu2 %1022 }
  0xd0   : > { %v1119_v28 = vadd.f32 %v1111_v63, %v1103_v26  ;;  %v1148_v58 = vmul.f32 %v1561_v31, %v1147_v6  ;;  %v1118_v61 = vadd.f32 %v1110_v59, %v1102_v30  ;;  %v1184_v14 = vand.u32 2147483647, %v2115_v50 }
  0xd1   : > { %v1134_v51 = vadd.f32 %v1559_v18, %v1133_v22  ;;  %v991_v63 = vadd.f32 %v969_v27, %v967_v44  ;;  %v1187_v62 = vor.u32 1.1754944e-38, %v1186_v25  ;;  %v1169_v1 = vand.u32 2147483647, %v2113_v49 }
  0xd2   : > { %v1563_v10 = vpop.eup %1562  ;;  %v2159_v37 = vadd.f32 1e-08, %v1119_v28  ;;  %v1149_v46 = vadd.f32 %v1561_v31, %v1148_v58  ;;  %v1171_v30 = vand.u32 2147483648, %v2113_v49  ;;  %v2182_v26 = vadd.f32 1e-08, %v1118_v61 }
  0xd3   : > { %v1138_v33 = vsel %vm2143_vm0, %v1559_v18, %v1134_v51  ;;  %v1161_v24 = vmul.f32 %v1563_v10, %v2113_v49  ;;  %v992_v52 = vrot.slane %v991_v63, 4  ;;  %vm1166_vm11 = vweird.f32 %v1563_v10 }
  0xd4   : > { %1458 = vmatmul.msk.f32.gmra.mxu1 %vm302_vm7, %v2040_v36  ;;  %v1143_v3 = vsel %vm2109_vm9, %v1142_v13, %v1138_v33  ;;  %v1153_v32 = vsel %vm2152_vm10, %v1561_v31, %v1149_v46  ;;  %1566 = vrcp.f32 %v2159_v37  ;;  %vm2187_vm6 = vmor %vm1165_vm1, %vm1166_vm11  ;;  %vm2191_vm4 = vcmp.eq.f32.partialorder %v1169_v1, 8.507059e+37 }
  0xd5   : > { %v1565_v59 = vpop.eup %1564  ;;  %v1144_v11 = vmul.f32 %v1143_v3, %v2105_v55  ;;  %v1158_v18 = vsel %vm2137_vm15, %v1157_v47, %v1153_v32  ;;  %v993_v16 = vadd.f32 %v992_v52, %v991_v63  ;;  %v721_v15 = vpop.xlane.xlu1 %720  ;;  %v1162_v13 = vsub.f32 1.0, %v1161_v24 }
  0xd6   : > { %v1176_v9 = vmul.f32 %v1565_v59, %v2115_v50  ;;  %v1159_v34 = vmul.f32 %v1158_v18, %v2107_v56  ;;  %vm1181_vm3 = vweird.f32 %v1565_v59  ;;  %v2179_v31 = vadd.f32 %v721_v15, %v2019_v2 }
  0xd7   : > { %v1250_v17 = vadd.f32 1.0, %v1144_v11  ;;  %v994_v27 = vrot.slane %v993_v16, 2  ;;  %v1163_v22 = vmul.f32 %v1563_v10, %v1162_v13  ;;  %v1172_v25 = vor.u32 1.1754944e-38, %v1171_v30  ;;  %vm2198_vm5 = vmor %vm1180_vm2, %vm1181_vm3 }
  0xd8   : > { %v1177_v55 = vsub.f32 1.0, %v1176_v9  ;;  %v1251_v6 = vadd.f32 1.0, %v1159_v34  ;;  %vm1185_vm8 = vcmp.eq.f32.partialorder %v1184_v14, 8.507059e+37  ;;  %v1079_v63 = vmul.f32 2.0, %v2126_v5 }
  0xd9   : > { %v1258_v39 = vmul.f32 %v1250_v17, %v1250_v17  ;;  %v995_v28 = vadd.f32 %v994_v27, %v993_v16  ;;  %v1164_v49 = vadd.f32 %v1563_v10, %v1163_v22  ;;  %1568 = vrcp.f32 %v2182_v26 }
  0xda   : > { %v1178_v47 = vmul.f32 %v1565_v59, %v1177_v55  ;;  %v1259_v58 = vmul.f32 %v1251_v6, %v1251_v6  ;;  %v2202_v44 = vpop.eup %1566  ;;  %v1214_v55 = vand.u32 2147483647, %v2159_v37  ;;  %vm1195_vm14 = vweird.f32 %v2182_v26 }
  0xdb   : > { %v1266_v51 = vmul.f32 0.25, %v1258_v39  ;;  %v996_v46 = vrot.slane %v995_v28, 1  ;;  %v1168_v1 = vsel %vm2187_vm6, %v1563_v10, %v1164_v49  ;;  %v1206_v15 = vmul.f32 %v2202_v44, %v2159_v37 }
  0xdc   : > { %1459 = vmatmul.msk.f32.vlgmr.msrb.gmra.mxu1 %vm302_vm7, %v2024_v40  ;;  %v1025_v40 = vpop.xlane.xlu0 %1024  ;;  %v1179_v12 = vadd.f32 %v1565_v59, %v1178_v47  ;;  %v1267_v24 = vmul.f32 0.25, %v1259_v58  ;;  %v1173_v3 = vsel %vm2191_vm4, %v1172_v25, %v1168_v1  ;;  %vm1211_vm9 = vweird.f32 %v2202_v44 }
  0xdd   : > { %v1047_v0 = vadd.f32 %v1025_v40, %v1023_v57  ;;  %v1274_v50 = vmul.f32 %v1642_v7, %v1266_v51  ;;  %v997_v32 = vadd.f32 %v996_v46, %v995_v28  ;;  %v1174_v18 = vmul.f32 %v1173_v3, %v2157_v54 }
  0xde   : > { %v1183_v52 = vsel %vm2198_vm5, %v1565_v59, %v1179_v12  ;;  %v1275_v14 = vmul.f32 %v1642_v7, %v1267_v24  ;;  %v1087_v59 = vmul.f32 %v1079_v63, %v2087_v20  ;;  %v1207_v57 = vsub.f32 1.0, %v1206_v15 }
  0xdf   : > { %v1048_v33 = vrot.slane %v1047_v0, 4  ;;  %v1188_v11 = vsel %vm1185_vm8, %v1187_v62, %v1183_v52  ;;  %1282 = vadd.xlane.f32.xlu1 %v1274_v50  ;;  %v1001_v9 = vmul.f32 0.00390625, %v997_v32  ;;  %v1252_v13 = vadd.f32 1.0, %v1174_v18 }
  0xe0   : > { %v1189_v10 = vmul.f32 %v1188_v11, %v2147_v35  ;;  %1284 = vadd.xlane.f32.xlu2 %v1275_v14  ;;  %v1569_v35 = vpop.eup %1568  ;;  %v1095_v27 = vadd.f32 1e-08, %v1087_v59  ;;  %v1208_v6 = vmul.f32 %v2202_v44, %v1207_v57  ;;  %vm2237_vm13 = vcmp.eq.f32.partialorder %v1214_v55, 8.507059e+37 }
  0xe1   : > { %v1049_v5 = vadd.f32 %v1048_v33, %v1047_v0  ;;  %v1260_v17 = vmul.f32 %v1252_v13, %v1252_v13  ;;  %v1065_v20 = vsub.f32 %v2007_v42, %v1001_v9  ;;  %v1216_v28 = vand.u32 2147483648, %v2159_v37 }
  0xe2   : > { %v1253_v34 = vadd.f32 1.0, %v1189_v10  ;;  %v1209_v25 = vadd.f32 %v2202_v44, %v1208_v6  ;;  %v1078_v0 = vmul.f32 2.0, %v2123_v23  ;;  %v1191_v49 = vmul.f32 %v1569_v35, %v2182_v26 }
  0xe3   : > { %v1050_v16 = vrot.slane %v1049_v5, 2  ;;  %v1268_v39 = vmul.f32 0.25, %v1260_v17  ;;  %v1217_v63 = vor.u32 1.1754944e-38, %v1216_v28  ;;  %vm1196_vm15 = vweird.f32 %v1569_v35 }
  0xe4   : > { %1460 = vmatmul.msk.f32.gmra.mxu1 %vm302_vm7, %v2040_v36  ;;  %vm1210_vm7 = vweird.f32 %v2159_v37  ;;  %v2223_v36 = vsub.f32 %v2012_v45, %v1001_v9  ;;  %v1261_v54 = vmul.f32 %v1253_v34, %v1253_v34  ;;  %v1086_v46 = vmul.f32 %v1078_v0, %v2080_v38  ;;  %vm1197_vm0 = vmor %vm1195_vm14, %vm1196_vm15 }
  0xe5   : > { %v1051_v62 = vadd.f32 %v1050_v16, %v1049_v5  ;;  %vm2233_vm12 = vmor %vm1210_vm7, %vm1211_vm9  ;;  %v1276_v61 = vmul.f32 %v1642_v7, %v1268_v39  ;;  %v1192_v37 = vsub.f32 1.0, %v1191_v49  ;;  %v1199_v23 = vand.u32 2147483647, %v2182_v26 }
  0xe6   : > { %v1104_v22 = vmul.f32 %v2223_v36, %v2223_v36  ;;  %v1269_v40 = vmul.f32 0.25, %v1261_v54  ;;  %v1213_v12 = vsel %vm2233_vm12, %v2202_v44, %v1209_v25  ;;  %v1201_v33 = vand.u32 2147483648, %v2182_v26 }
  0xe7   : > { %v1052_v30 = vrot.slane %v1051_v62, 1  ;;  %1286 = vadd.xlane.f32.xlu0 %v1276_v61  ;;  %v1105_v24 = vmul.f32 %v1065_v20, %v1065_v20  ;;  %v1218_v52 = vsel %vm2237_vm13, %v1217_v63, %v1213_v12  ;;  %v1193_v3 = vmul.f32 %v1569_v35, %v1192_v37 }
  0xe8   : > { %v1277_v58 = vmul.f32 %v1642_v7, %v1269_v40  ;;  %v1219_v44 = vmul.f32 %v1218_v52, %v1095_v27  ;;  %v1202_v5 = vor.u32 1.1754944e-38, %v1201_v33  ;;  %v1094_v11 = vadd.f32 1e-08, %v1086_v46 }
  0xe9   : > { %v1053_v2 = vadd.f32 %v1052_v30, %v1051_v62  ;;  %v1194_v10 = vadd.f32 %v1569_v35, %v1193_v3  ;;  %vm1200_vm2 = vcmp.eq.f32.partialorder %v1199_v23, 8.507059e+37  ;;  %v1081_v54 = vmul.f32 2.0, %v1065_v20 }
  0xea   : > { %1288 = vadd.xlane.f32.xlu1 %v1277_v58  ;;  %v1255_v14 = vadd.f32 1.0, %v1219_v44  ;;  %v1080_v17 = vmul.f32 2.0, %v2223_v36  ;;  %vm1334_vm7 = vcmp.eq.s32.totalorder %v1633_v4, 0  ;;  %vm1339_vm9 = vcmp.eq.s32.totalorder %v1633_v4, 1 }
  0xeb   : > { %v1057_v51 = vmul.f32 0.00390625, %v1053_v2  ;;  %v1198_v16 = vsel %vm1197_vm0, %v1569_v35, %v1194_v10  ;;  %vm1348_vm12 = vcmp.eq.s32.totalorder %v1633_v4, 2  ;;  %vm1357_vm13 = vcmp.eq.s32.totalorder %v1633_v4, 3 }
  0xec   : > { %v1203_v15 = vsel %vm1200_vm2, %v1202_v5, %v1198_v16  ;;  %vm1366_vm14 = vcmp.eq.s32.totalorder %v1633_v4, 4 }
  0xed   : > { %v1072_v1 = vsub.f32 %v1857_v19, %v1057_v51  ;;  %v1073_v50 = vsub.f32 %v1932_v60, %v1057_v51  ;;  %v1263_v19 = vmul.f32 %v1255_v14, %v1255_v14  ;;  %v1204_v13 = vmul.f32 %v1203_v15, %v1094_v11 }
  0xef   : > { %v1112_v32 = vmul.f32 %v1072_v1, %v1072_v1  ;;  %v1113_v38 = vmul.f32 %v1073_v50, %v1073_v50  ;;  %v1271_v34 = vmul.f32 0.25, %v1263_v19  ;;  %v1254_v26 = vadd.f32 1.0, %v1204_v13 }
  0xf0   : > { %v1089_v6 = vmul.f32 %v1081_v54, %v1073_v50  ;;  %v1088_v47 = vmul.f32 %v1080_v17, %v1072_v1 }
  0xf1   : > { %v1120_v18 = vadd.f32 %v1112_v32, %v1104_v22  ;;  %v1121_v9 = vadd.f32 %v1113_v38, %v1105_v24  ;;  %v1279_v62 = vmul.f32 %v1642_v7, %v1271_v34  ;;  %v1262_v57 = vmul.f32 %v1254_v26, %v1254_v26  ;;  %v1575_v26 = vld [vmem:[%s1650_s5 + $0x8] sm:$0xff] }
  0xf2   : > { %v1096_v49 = vadd.f32 1e-08, %v1088_v47  ;;  %v1097_v12 = vadd.f32 1e-08, %v1089_v6  ;;  %v811_v47 = vmul.f32 %v1575_v26, %v1923_v43 }
  0xf3   : > { %v1128_v60 = vadd.f32 1e-08, %v1120_v18  ;;  %v1129_v59 = vadd.f32 1e-08, %v1121_v9  ;;  %1292 = vadd.xlane.f32.xlu0 %v1279_v62  ;;  %v1270_v55 = vmul.f32 0.25, %v1262_v57  ;;  %v1574_v18 = vld [vmem:[%s1650_s5] sm:$0xff] }
  0xf5   : > { %1570 = vrcp.f32 %v1128_v60  ;;  %v1278_v35 = vmul.f32 %v1642_v7, %v1270_v55  ;;  %v1246_v39 = vand.u32 2147483648, %v1129_v59  ;;  %v1231_v56 = vand.u32 2147483648, %v1128_v60 }
  0xf6   : > { %1572 = vrcp.f32 %v1129_v59  ;;  %vm1225_vm10 = vweird.f32 %v1128_v60  ;;  %v1229_v25 = vand.u32 2147483647, %v1128_v60  ;;  %vm1240_vm11 = vweird.f32 %v1129_v59 }
  0xf7   : > { %1290 = vadd.xlane.f32.xlu2 %v1278_v35  ;;  %v1244_v36 = vand.u32 2147483647, %v1129_v59  ;;  %v1232_v58 = vor.u32 1.1754944e-38, %v1231_v56  ;;  %v1247_v61 = vor.u32 1.1754944e-38, %v1246_v39  ;;  %v879_v56 = vadd.f32 %v1575_v26, %v1923_v43 }
  0xf8   : > { %vm1230_vm5 = vcmp.eq.f32.partialorder %v1229_v25, 8.507059e+37 }
  0xf9   : > { %vm1245_vm8 = vcmp.eq.f32.partialorder %v1244_v36, 8.507059e+37 }
  0xfb   : > { %v1571_v30 = vpop.eup %1570 }
  0xfc   : > { %v1573_v27 = vpop.eup %1572  ;;  %v1221_v22 = vmul.f32 %v1571_v30, %v1128_v60  ;;  %vm1226_vm1 = vweird.f32 %v1571_v30  ;;  %v810_v60 = vmul.f32 %v1574_v18, %v1938_v53 }
  0xfd   : > { %v1236_v40 = vmul.f32 %v1573_v27, %v1129_v59  ;;  %vm1241_vm3 = vweird.f32 %v1573_v27  ;;  %vm1227_vm6 = vmor %vm1225_vm10, %vm1226_vm1  ;;  %v878_v59 = vadd.f32 %v1574_v18, %v1938_v53 }
  0xfe   : > { %v1222_v2 = vsub.f32 1.0, %v1221_v22  ;;  %vm1242_vm4 = vmor %vm1240_vm11, %vm1241_vm3 }
  0xff   : > { %v1237_v28 = vsub.f32 1.0, %v1236_v40  ;;  %v1576_v40 = vld [vmem:[%s1650_s5 + $0x18] sm:$0xff] }
 0x100   : > { %v1223_v20 = vmul.f32 %v1571_v30, %v1222_v2 }
 0x101   : > { %v1238_v0 = vmul.f32 %v1573_v27, %v1237_v28 }
 0x102   : > { %v1224_v51 = vadd.f32 %v1571_v30, %v1223_v20 }
 0x103   : > { %v1239_v63 = vadd.f32 %v1573_v27, %v1238_v0 }
 0x104   : > { %v1228_v46 = vsel %vm1227_vm6, %v1571_v30, %v1224_v51  ;;  %v1577_v51 = vld [vmem:[%s1650_s5 + $0x10] sm:$0xff] }
 0x105   : > { %v1243_v37 = vsel %vm1242_vm4, %v1573_v27, %v1239_v63  ;;  %v1233_v23 = vsel %vm1230_vm5, %v1232_v58, %v1228_v46 }
 0x106   : > { %v1248_v33 = vsel %vm1245_vm8, %v1247_v61, %v1243_v37  ;;  %v1234_v24 = vmul.f32 %v1233_v23, %v1096_v49  ;;  %v813_v23 = vmul.f32 %v1576_v40, %v1961_v8 }
 0x107   : > { %v1249_v1 = vmul.f32 %v1248_v33, %v1097_v12 }
 0x108   : > { %v1256_v50 = vadd.f32 1.0, %v1234_v24 }
 0x109   : > { %v1257_v52 = vadd.f32 1.0, %v1249_v1 }
 0x10a   : > { %v1264_v44 = vmul.f32 %v1256_v50, %v1256_v50 }
 0x10b   : > { %v1265_v3 = vmul.f32 %v1257_v52, %v1257_v52 }
 0x10c   : > { %v1272_v32 = vmul.f32 0.25, %v1264_v44 }
 0x10d   : > { %v1273_v38 = vmul.f32 0.25, %v1265_v3 }
 0x10e   : > { %v1280_v5 = vmul.f32 %v1642_v7, %v1272_v32 }
 0x10f   : > { %v1281_v14 = vmul.f32 %v1642_v7, %v1273_v38 }
 0x110   : > { %1294 = vadd.xlane.f32.xlu1 %v1280_v5  ;;  %v1578_v5 = vld [vmem:[%s1650_s5 + $0x20] sm:$0xff] }
 0x111   : > { %1296 = vadd.xlane.f32.xlu2 %v1281_v14 }
 0x122   : > { %v723_v62 = vpop.xlane.xlu2 %722 }
 0x12e   : > { %v727_v25 = vpop.xlane.xlu1 %726 }
 0x131   : > { %v326_v11 = vpop.f32.mrf.mxu1  ;;  %v729_v0 = vpop.xlane.xlu2 %728 }
 0x132   : > { %v332_v10 = vmul.f32 0.0010405828, %v326_v11  ;;  %v2275_v61 = vadd.f32 %v729_v0, %v727_v25 }
 0x134   : > { %v334_v9 = vsub.f32 %v332_v10, %v1574_v18 }
 0x136   : > { %v336_v19 = vand.u32 2147483647, %v334_v9  ;;  %v725_v58 = vpop.xlane.xlu0 %724 }
 0x137   : > { %v2277_v49 = vadd.f32 %v725_v58, %v723_v62 }
 0x138   : > { %v338_v16 = vmul.f32 5.0, %v336_v19  ;;  %v881_v19 = vadd.f32 %v1576_v40, %v1961_v8 }
 0x139   : > { %v329_v15 = vpop.f32.mrf.mxu1 }
 0x13a   : > { %v340_v34 = vadd.f32 1.0, %v338_v16  ;;  %v333_v13 = vmul.f32 0.0010405828, %v329_v15  ;;  %v880_v16 = vadd.f32 %v1577_v51, %v1955_v21 }
 0x13c   : > { %v335_v57 = vsub.f32 %v333_v13, %v1575_v26  ;;  %v758_v54 = vmul.f32 %v1642_v7, %v340_v34  ;;  %v818_v17 = vmul.f32 %v810_v60, %v340_v34  ;;  %v886_v55 = vmul.f32 %v878_v59, %v340_v34  ;;  %v1579_v26 = vld [vmem:[%s1650_s5 + $0x28] sm:$0xff] }
 0x13d   : > { %v364_v30 = vpop.f32.mrf.mxu2 }
 0x13e   : > { %v337_v27 = vand.u32 2147483647, %v335_v57  ;;  %766 = vadd.xlane.f32.xlu0 %v758_v54  ;;  %v826_v35 = vmul.f32 %v1642_v7, %v818_v17  ;;  %v894_v6 = vmul.f32 %v1642_v7, %v886_v55  ;;  %v368_v22 = vmul.f32 0.0010405828, %v364_v30 }
 0x13f   : > { %v812_v17 = vmul.f32 %v1577_v51, %v1955_v21 }
 0x140   : > { %v339_v53 = vmul.f32 5.0, %v337_v27  ;;  %834 = vadd.xlane.f32.xlu2 %v826_v35  ;;  %902 = vadd.xlane.f32.xlu1 %v894_v6  ;;  %v370_v39 = vsub.f32 %v368_v22, %v1576_v40  ;;  %v814_v27 = vmul.f32 %v1578_v5, %v1976_v48  ;;  %v882_v35 = vadd.f32 %v1578_v5, %v1976_v48 }
 0x141   : > { %v361_v2 = vpop.f32.mrf.mxu1 }
 0x142   : > { %v341_v28 = vadd.f32 1.0, %v339_v53  ;;  %v367_v36 = vmul.f32 0.0010405828, %v361_v2  ;;  %v372_v20 = vand.u32 2147483647, %v370_v39  ;;  %v1580_v2 = vld [vmem:[%s1650_s5 + $0x30] sm:$0xff] }
 0x144   : > { %v369_v12 = vsub.f32 %v367_v36, %v1577_v51  ;;  %v374_v63 = vmul.f32 5.0, %v372_v20  ;;  %v819_v46 = vmul.f32 %v811_v47, %v341_v28  ;;  %v887_v37 = vmul.f32 %v879_v56, %v341_v28 }
 0x145   : > { %v759_v50 = vmul.f32 %v1642_v7, %v341_v28  ;;  %v815_v47 = vmul.f32 %v1579_v26, %v1984_v41 }
 0x146   : > { %v371_v43 = vand.u32 2147483647, %v369_v12  ;;  %v376_v33 = vadd.f32 1.0, %v374_v63  ;;  %v827_v24 = vmul.f32 %v1642_v7, %v819_v46  ;;  %v895_v1 = vmul.f32 %v1642_v7, %v887_v37  ;;  %v1581_v12 = vld [vmem:[%s1650_s5 + $0x38] sm:$0xff] }
 0x147   : > { %v883_v46 = vadd.f32 %v1579_v26, %v1984_v41 }
 0x148   : > { %v373_v52 = vmul.f32 5.0, %v371_v43  ;;  %836 = vadd.xlane.f32.xlu0 %v827_v24  ;;  %904 = vadd.xlane.f32.xlu2 %v895_v1  ;;  %v821_v3 = vmul.f32 %v813_v23, %v376_v33  ;;  %v761_v11 = vmul.f32 %v1642_v7, %v376_v33  ;;  %v889_v13 = vmul.f32 %v881_v19, %v376_v33 }
 0x149   : > { %768 = vadd.xlane.f32.xlu1 %v759_v50  ;;  %v397_v44 = vpop.f32.mrf.mxu1 }
 0x14a   : > { %v375_v32 = vadd.f32 1.0, %v373_v52  ;;  %v403_v38 = vmul.f32 0.0010405828, %v397_v44  ;;  %v829_v18 = vmul.f32 %v1642_v7, %v821_v3  ;;  %v897_v8 = vmul.f32 %v1642_v7, %v889_v13 }
 0x14b   : > { %v817_v3 = vmul.f32 %v1581_v12, %v2007_v42 }
 0x14c   : > { %v405_v14 = vsub.f32 %v403_v38, %v1578_v5  ;;  %v760_v10 = vmul.f32 %v1642_v7, %v375_v32  ;;  %v888_v62 = vmul.f32 %v880_v16, %v375_v32  ;;  %v820_v40 = vmul.f32 %v812_v17, %v375_v32 }
 0x14d   : > { %v816_v38 = vmul.f32 %v1580_v2, %v2012_v45 }
 0x14e   : > { %v407_v9 = vand.u32 2147483647, %v405_v14  ;;  %v896_v30 = vmul.f32 %v1642_v7, %v888_v62  ;;  %v828_v28 = vmul.f32 %v1642_v7, %v820_v40 }
 0x150   : > { %v409_v60 = vmul.f32 5.0, %v407_v9  ;;  %772 = vadd.xlane.f32.xlu0 %v761_v11  ;;  %770 = vadd.xlane.f32.xlu2 %v760_v10  ;;  %v885_v10 = vadd.f32 %v1581_v12, %v2007_v42  ;;  %v884_v9 = vadd.f32 %v1580_v2, %v2012_v45 }
 0x151   : > { %840 = vadd.xlane.f32.xlu1 %v829_v18  ;;  %v400_v59 = vpop.f32.mrf.mxu1 }
 0x152   : > { %v411_v15 = vadd.f32 1.0, %v409_v60  ;;  %v404_v34 = vmul.f32 0.0010405828, %v400_v59 }
 0x154   : > { %v406_v57 = vsub.f32 %v404_v34, %v1579_v26  ;;  %v762_v54 = vmul.f32 %v1642_v7, %v411_v15  ;;  %v822_v39 = vmul.f32 %v814_v27, %v411_v15  ;;  %v890_v21 = vmul.f32 %v882_v35, %v411_v15  ;;  %v1283_v15 = vpop.xlane.xlu1 %1282  ;;  %v1285_v34 = vpop.xlane.xlu2 %1284 }
 0x155   : > { %v1298_v42 = vadd.f32 %v1285_v34, %v1283_v15 }
 0x156   : > { %v408_v55 = vand.u32 2147483647, %v406_v57  ;;  %v830_v36 = vmul.f32 %v1642_v7, %v822_v39  ;;  %v898_v48 = vmul.f32 %v1642_v7, %v890_v21 }
 0x157   : > { %v1299_v45 = vrot.slane %v1298_v42, 4 }
 0x158   : > { %908 = vadd.xlane.f32.xlu0 %v897_v8  ;;  %906 = vadd.xlane.f32.xlu2 %v896_v30  ;;  %v410_v22 = vmul.f32 5.0, %v408_v55  ;;  %v731_v8 = vrot.slane %v2026_v29, 4 }
 0x159   : > { %774 = vadd.xlane.f32.xlu1 %v762_v54  ;;  %v433_v6 = vpop.f32.mrf.mxu1  ;;  %v1300_v55 = vadd.f32 %v1299_v45, %v1298_v42 }
 0x15a   : > { %v439_v53 = vmul.f32 0.0010405828, %v433_v6  ;;  %v412_v56 = vadd.f32 1.0, %v410_v22  ;;  %v1287_v13 = vpop.xlane.xlu0 %1286  ;;  %v732_v6 = vadd.f32 %v731_v8, %v2026_v29 }
 0x15c   : > { %v441_v25 = vsub.f32 %v439_v53, %v1580_v2  ;;  %v823_v51 = vmul.f32 %v815_v47, %v412_v56  ;;  %v763_v33 = vmul.f32 %v1642_v7, %v412_v56  ;;  %v891_v52 = vmul.f32 %v883_v46, %v412_v56 }
 0x15d   : > { %v1289_v62 = vpop.xlane.xlu1 %1288  ;;  %v733_v53 = vrot.slane %v732_v6, 2 }
 0x15e   : > { %v443_v0 = vand.u32 2147483647, %v441_v25  ;;  %v831_v43 = vmul.f32 %v1642_v7, %v823_v51  ;;  %v899_v41 = vmul.f32 %v1642_v7, %v891_v52  ;;  %v1305_v21 = vadd.f32 %v1289_v62, %v1287_v13 }
 0x160   : > { %838 = vadd.xlane.f32.xlu0 %v828_v28  ;;  %842 = vadd.xlane.f32.xlu2 %v830_v36  ;;  %v445_v37 = vmul.f32 5.0, %v443_v0  ;;  %v734_v36 = vadd.f32 %v733_v53, %v732_v6 }
 0x161   : > { %910 = vadd.xlane.f32.xlu1 %v898_v48  ;;  %v436_v20 = vpop.f32.mrf.mxu1 }
 0x162   : > { %v440_v58 = vmul.f32 0.0010405828, %v436_v20  ;;  %v447_v1 = vadd.f32 1.0, %v445_v37  ;;  %v735_v29 = vrot.slane %v734_v36, 1 }
 0x164   : > { %v442_v63 = vsub.f32 %v440_v58, %v1581_v12  ;;  %v764_v32 = vmul.f32 %v1642_v7, %v447_v1  ;;  %v824_v14 = vmul.f32 %v816_v38, %v447_v1  ;;  %v892_v16 = vmul.f32 %v884_v9, %v447_v1 }
 0x165   : > { %v1306_v58 = vrot.slane %v1305_v21, 4 }
 0x166   : > { %v444_v23 = vand.u32 2147483647, %v442_v63  ;;  %v832_v18 = vmul.f32 %v1642_v7, %v824_v14  ;;  %v900_v59 = vmul.f32 %v1642_v7, %v892_v16  ;;  %v1293_v57 = vpop.xlane.xlu0 %1292 }
 0x168   : > { %v446_v24 = vmul.f32 5.0, %v444_v23  ;;  %844 = vadd.xlane.f32.xlu0 %v831_v43  ;;  %776 = vadd.xlane.f32.xlu2 %v763_v33  ;;  %v738_v43 = vrot.slane %v2179_v31, 4 }
 0x16a   : > { %v448_v50 = vadd.f32 1.0, %v446_v24  ;;  %v1291_v26 = vpop.xlane.xlu2 %1290 }
 0x16c   : > { %v765_v44 = vmul.f32 %v1642_v7, %v448_v50  ;;  %v825_v5 = vmul.f32 %v817_v3, %v448_v50  ;;  %v893_v19 = vmul.f32 %v885_v10, %v448_v50  ;;  %v1307_v50 = vadd.f32 %v1306_v58, %v1305_v21 }
 0x16d   : > { %v1312_v10 = vadd.f32 %v1293_v57, %v1291_v26 }
 0x16e   : > { %780 = vadd.xlane.f32.xlu1 %v765_v44  ;;  %v833_v11 = vmul.f32 %v1642_v7, %v825_v5  ;;  %v901_v60 = vmul.f32 %v1642_v7, %v893_v19  ;;  %v1301_v7 = vrot.slane %v1300_v55, 2  ;;  %v736_v5 = vadd.f32 %v735_v29, %v734_v36 }
 0x16f   : > { %v1308_v19 = vrot.slane %v1307_v50, 2  ;;  %v1313_v42 = vrot.slane %v1312_v10, 4  ;;  %v745_v36 = vrot.slane %v2277_v49, 4 }
 0x170   : > { %778 = vadd.xlane.f32.xlu0 %v764_v32  ;;  %912 = vadd.xlane.f32.xlu2 %v899_v41  ;;  %v1302_v22 = vadd.f32 %v1301_v7, %v1300_v55  ;;  %v1335_v34 = vsel %vm1334_vm7, %v736_v5, 0.0 }
 0x171   : > { %v1309_v55 = vadd.f32 %v1308_v19, %v1307_v50  ;;  %v746_v29 = vadd.f32 %v745_v36, %v2277_v49 }
 0x172   : > { %v1303_v25 = vrot.slane %v1302_v22, 1 }
 0x174   : > { %v1304_v63 = vadd.f32 %v1303_v25, %v1302_v22 }
 0x176   : > { %848 = vadd.xlane.f32.xlu1 %v833_v11  ;;  %v1326_v3 = vmul.f32 0.00390625, %v1304_v63  ;;  %v739_v11 = vadd.f32 %v738_v43, %v2179_v31 }
 0x178   : > { %846 = vadd.xlane.f32.xlu0 %v832_v18  ;;  %v740_v62 = vrot.slane %v739_v11, 2 }
 0x17a   : > { %v741_v53 = vadd.f32 %v740_v62, %v739_v11 }
 0x17e   : > { %916 = vadd.xlane.f32.xlu1 %v901_v60  ;;  %v1330_v60 = vsub.f32 1.0, %v1326_v3 }
 0x180   : > { %914 = vadd.xlane.f32.xlu0 %v900_v59 }
 0x183   : > { %v2319_v17 = vpop.xlane.xlu1 %1294 }
 0x184   : > { %v2317_v54 = vpop.xlane.xlu2 %1296 }
 0x1b1   : > { %v767_v30 = vpop.xlane.xlu0 %766 }
 0x1b3   : > { %v835_v27 = vpop.xlane.xlu2 %834  ;;  %v903_v35 = vpop.xlane.xlu1 %902 }
 0x1bb   : > { %v905_v40 = vpop.xlane.xlu2 %904  ;;  %v837_v39 = vpop.xlane.xlu0 %836 }
 0x1bc   : > { %v918_v47 = vadd.f32 %v905_v40, %v903_v35  ;;  %v769_v56 = vpop.xlane.xlu1 %768  ;;  %v850_v2 = vadd.f32 %v837_v39, %v835_v27  ;;  %v1349_v27 = vsel %vm1348_vm12, %v1330_v60, 0.0  ;;  %v1314_v40 = vadd.f32 %v1313_v42, %v1312_v10 }
 0x1bd   : > { %v782_v28 = vadd.f32 %v769_v56, %v767_v30  ;;  %v1319_v39 = vadd.f32 %v2317_v54, %v2319_v17  ;;  %v1310_v56 = vrot.slane %v1309_v55, 1  ;;  %v742_v17 = vrot.slane %v741_v53, 1 }
 0x1be   : > { %v919_v48 = vrot.slane %v918_v47, 4  ;;  %v851_v20 = vrot.slane %v850_v2, 4 }
 0x1bf   : > { %v783_v0 = vrot.slane %v782_v28, 4  ;;  %v1311_v63 = vadd.f32 %v1310_v56, %v1309_v55  ;;  %v743_v43 = vadd.f32 %v742_v17, %v741_v53 }
 0x1c0   : > { %v920_v51 = vadd.f32 %v919_v48, %v918_v47  ;;  %v852_v12 = vadd.f32 %v851_v20, %v850_v2  ;;  %v1315_v20 = vrot.slane %v1314_v40, 2 }
 0x1c1   : > { %v784_v46 = vadd.f32 %v783_v0, %v782_v28  ;;  %v1320_v0 = vrot.slane %v1319_v39, 4  ;;  %v1327_v50 = vmul.f32 0.00390625, %v1311_v63 }
 0x1c2   : > { %v921_v37 = vrot.slane %v920_v51, 2  ;;  %v853_v23 = vrot.slane %v852_v12, 2 }
 0x1c3   : > { %v785_v33 = vrot.slane %v784_v46, 2  ;;  %v771_v24 = vpop.xlane.xlu2 %770  ;;  %v773_v1 = vpop.xlane.xlu0 %772 }
 0x1c4   : > { %v854_v52 = vadd.f32 %v853_v23, %v852_v12  ;;  %v789_v44 = vadd.f32 %v773_v1, %v771_v24  ;;  %v922_v32 = vadd.f32 %v921_v37, %v920_v51  ;;  %v841_v38 = vpop.xlane.xlu1 %840  ;;  %v1321_v24 = vadd.f32 %v1320_v0, %v1319_v39 }
 0x1c5   : > { %v786_v41 = vadd.f32 %v785_v33, %v784_v46  ;;  %v1316_v33 = vadd.f32 %v1315_v20, %v1314_v40 }
 0x1c6   : > { %v790_v14 = vrot.slane %v789_v44, 4  ;;  %v855_v9 = vrot.slane %v854_v52, 1  ;;  %v923_v59 = vrot.slane %v922_v32, 1 }
 0x1c7   : > { %v787_v18 = vrot.slane %v786_v41, 1  ;;  %v1317_v49 = vrot.slane %v1316_v33, 1 }
 0x1c8   : > { %v791_v16 = vadd.f32 %v790_v14, %v789_v44  ;;  %v856_v26 = vadd.f32 %v855_v9, %v854_v52  ;;  %v924_v35 = vadd.f32 %v923_v59, %v922_v32  ;;  %v752_v44 = vrot.slane %v2275_v61, 4 }
 0x1c9   : > { %v788_v15 = vadd.f32 %v787_v18, %v786_v41  ;;  %v747_v32 = vrot.slane %v746_v29, 2  ;;  %v1322_v14 = vrot.slane %v1321_v24, 2  ;;  %v1331_v9 = vsub.f32 1.0, %v1327_v50 }
 0x1ca   : > { %v792_v13 = vrot.slane %v791_v16, 2  ;;  %v1358_v21 = vsel %vm1357_vm13, %v856_v26, 0.0  ;;  %v1367_v28 = vsel %vm1366_vm14, %v924_v35, 0.0  ;;  %v753_v59 = vadd.f32 %v752_v44, %v2275_v61 }
 0x1cb   : > { %v1340_v31 = vsel %vm1339_vm9, %v788_v15, 0.0  ;;  %v907_v57 = vpop.xlane.xlu2 %906  ;;  %v909_v45 = vpop.xlane.xlu0 %908  ;;  %v1323_v26 = vadd.f32 %v1322_v14, %v1321_v24 }
 0x1cc   : > { %v1344_v8 = vadd.f32 %v1340_v31, %v1335_v34  ;;  %v925_v30 = vadd.f32 %v909_v45, %v907_v57  ;;  %v793_v6 = vadd.f32 %v792_v13, %v791_v16  ;;  %v775_v47 = vpop.xlane.xlu1 %774  ;;  %v748_v34 = vadd.f32 %v747_v32, %v746_v29 }
 0x1cd   : > { %v1318_v31 = vadd.f32 %v1317_v49, %v1316_v33  ;;  %v1350_v45 = vsel %vm1348_vm12, %v1331_v9, 0.0  ;;  %v1324_v39 = vrot.slane %v1323_v26, 1 }
 0x1ce   : > { %v1353_v7 = vadd.f32 %v1349_v27, %v1344_v8  ;;  %v926_v22 = vrot.slane %v925_v30, 4  ;;  %v794_v54 = vrot.slane %v793_v6, 1  ;;  %v754_v27 = vrot.slane %v753_v59, 2 }
 0x1cf   : > { %v1328_v40 = vmul.f32 0.00390625, %v1318_v31  ;;  %v1325_v63 = vadd.f32 %v1324_v39, %v1323_v26 }
 0x1d0   : > { %v1362_v2 = vadd.f32 %v1358_v21, %v1353_v7  ;;  %v927_v25 = vadd.f32 %v926_v22, %v925_v30  ;;  %v795_v37 = vadd.f32 %v794_v54, %v793_v6  ;;  %v749_v6 = vrot.slane %v748_v34, 1 }
 0x1d1   : > { %v755_v54 = vadd.f32 %v754_v27, %v753_v59 }
 0x1d2   : > { %v1371_v48 = vadd.f32 %v1367_v28, %v1362_v2  ;;  %v928_v58 = vrot.slane %v927_v25, 2  ;;  %v1341_v41 = vsel %vm1339_vm9, %v795_v37, 0.0  ;;  %v750_v20 = vadd.f32 %v749_v6, %v748_v34 }
 0x1d3   : > { %v843_v51 = vpop.xlane.xlu2 %842  ;;  %v839_v12 = vpop.xlane.xlu0 %838 }
 0x1d4   : > { %1375 = vst [vmem:[%s2346_s13] sm:$0x1] %v1371_v48  ;;  %v857_v46 = vadd.f32 %v841_v38, %v839_v12  ;;  %v929_v1 = vadd.f32 %v928_v58, %v927_v25  ;;  %v911_v3 = vpop.xlane.xlu1 %910  ;;  %v1336_v38 = vsel %vm1334_vm7, %v743_v43, 0.0  ;;  %v1332_v12 = vsub.f32 1.0, %v1328_v40 }
 0x1d5   : > { %v1345_v15 = vadd.f32 %v1341_v41, %v1336_v38  ;;  %v756_v43 = vrot.slane %v755_v54, 1  ;;  %v1337_v24 = vsel %vm1334_vm7, %v750_v20, 0.0 }
 0x1d6   : > { %v858_v23 = vrot.slane %v857_v46, 4  ;;  %v930_v11 = vrot.slane %v929_v1, 1  ;;  %v1351_v44 = vsel %vm1348_vm12, %v1332_v12, 0.0 }
 0x1d7   : > { %v1354_v35 = vadd.f32 %v1350_v45, %v1345_v15 }
 0x1d8   : > { %v859_v52 = vadd.f32 %v858_v23, %v857_v46  ;;  %v931_v57 = vadd.f32 %v930_v11, %v929_v1 }
 0x1da   : > { %v860_v5 = vrot.slane %v859_v52, 2  ;;  %v1368_v21 = vsel %vm1366_vm14, %v931_v57, 0.0 }
 0x1db   : > { %v777_v10 = vpop.xlane.xlu2 %776  ;;  %v845_v18 = vpop.xlane.xlu0 %844 }
 0x1dc   : > { %v861_v19 = vadd.f32 %v860_v5, %v859_v52  ;;  %v796_v16 = vadd.f32 %v777_v10, %v775_v47  ;;  %v864_v60 = vadd.f32 %v845_v18, %v843_v51  ;;  %v757_v10 = vadd.f32 %v756_v43, %v755_v54 }
 0x1de   : > { %v862_v13 = vrot.slane %v861_v19, 1  ;;  %v797_v62 = vrot.slane %v796_v16, 4  ;;  %v865_v42 = vrot.slane %v864_v60, 4 }
 0x1e0   : > { %v863_v55 = vadd.f32 %v862_v13, %v861_v19  ;;  %v798_v8 = vadd.f32 %v797_v62, %v796_v16  ;;  %v866_v30 = vadd.f32 %v865_v42, %v864_v60  ;;  %v1338_v62 = vsel %vm1334_vm7, %v757_v10, 0.0 }
 0x1e1   : > { %v781_v7 = vpop.xlane.xlu1 %780 }
 0x1e2   : > { %v1359_v61 = vsel %vm1357_vm13, %v863_v55, 0.0  ;;  %v799_v22 = vrot.slane %v798_v8, 2  ;;  %v867_v53 = vrot.slane %v866_v30, 2 }
 0x1e3   : > { %v1363_v47 = vadd.f32 %v1359_v61, %v1354_v35  ;;  %v913_v56 = vpop.xlane.xlu2 %912  ;;  %v779_v2 = vpop.xlane.xlu0 %778 }
 0x1e4   : > { %v800_v25 = vadd.f32 %v799_v22, %v798_v8  ;;  %v868_v28 = vadd.f32 %v867_v53, %v866_v30  ;;  %v932_v36 = vadd.f32 %v913_v56, %v911_v3  ;;  %v803_v48 = vadd.f32 %v781_v7, %v779_v2 }
 0x1e5   : > { %v1372_v17 = vadd.f32 %v1368_v21, %v1363_v47  ;;  %v1329_v3 = vmul.f32 0.00390625, %v1325_v63 }
 0x1e6   : > { %v801_v0 = vrot.slane %v800_v25, 1  ;;  %v933_v58 = vrot.slane %v932_v36, 4  ;;  %v804_v51 = vrot.slane %v803_v48, 4  ;;  %v869_v29 = vrot.slane %v868_v28, 1 }
 0x1e7   : > { %1376 = vst [vmem:[%s2346_s13 + $0x1] sm:$0x1] %v1372_v17  ;;  %v1333_v16 = vsub.f32 1.0, %v1329_v3 }
 0x1e8   : > { %v802_v46 = vadd.f32 %v801_v0, %v800_v25  ;;  %v934_v37 = vadd.f32 %v933_v58, %v932_v36  ;;  %v805_v23 = vadd.f32 %v804_v51, %v803_v48  ;;  %v870_v5 = vadd.f32 %v869_v29, %v868_v28 }
 0x1e9   : > { %v849_v33 = vpop.xlane.xlu1 %848  ;;  %v1352_v30 = vsel %vm1348_vm12, %v1333_v16, 0.0 }
 0x1ea   : > { %v1342_v1 = vsel %vm1339_vm9, %v802_v46, 0.0  ;;  %v935_v50 = vrot.slane %v934_v37, 2  ;;  %v806_v52 = vrot.slane %v805_v23, 2  ;;  %v1360_v60 = vsel %vm1357_vm13, %v870_v5, 0.0 }
 0x1eb   : > { %v1346_v32 = vadd.f32 %v1342_v1, %v1337_v24  ;;  %v847_v41 = vpop.xlane.xlu0 %846 }
 0x1ec   : > { %v936_v38 = vadd.f32 %v935_v50, %v934_v37  ;;  %v807_v49 = vadd.f32 %v806_v52, %v805_v23  ;;  %v871_v14 = vadd.f32 %v849_v33, %v847_v41 }
 0x1ed   : > { %v1355_v11 = vadd.f32 %v1351_v44, %v1346_v32 }
 0x1ee   : > { %v937_v18 = vrot.slane %v936_v38, 1  ;;  %v808_v9 = vrot.slane %v807_v49, 1  ;;  %v872_v19 = vrot.slane %v871_v14, 4 }
 0x1ef   : > { %v1364_v13 = vadd.f32 %v1360_v60, %v1355_v11 }
 0x1f0   : > { %v938_v59 = vadd.f32 %v937_v18, %v936_v38  ;;  %v809_v15 = vadd.f32 %v808_v9, %v807_v49  ;;  %v873_v34 = vadd.f32 %v872_v19, %v871_v14 }
 0x1f1   : > { %v917_v55 = vpop.xlane.xlu1 %916 }
 0x1f2   : > { %v1369_v42 = vsel %vm1366_vm14, %v938_v59, 0.0  ;;  %v1343_v31 = vsel %vm1339_vm9, %v809_v15, 0.0  ;;  %v874_v26 = vrot.slane %v873_v34, 2 }
 0x1f3   : > { %v1373_v57 = vadd.f32 %v1369_v42, %v1364_v13  ;;  %v1347_v45 = vadd.f32 %v1343_v31, %v1338_v62  ;;  %v915_v8 = vpop.xlane.xlu0 %914 }
 0x1f4   : > { %v875_v27 = vadd.f32 %v874_v26, %v873_v34  ;;  %v939_v35 = vadd.f32 %v917_v55, %v915_v8 }
 0x1f5   : > { %1377 = vst [vmem:[%s2346_s13 + $0x2] sm:$0x1] %v1373_v57  ;;  %v1356_v7 = vadd.f32 %v1352_v30, %v1347_v45 }
 0x1f6   : > { %v876_v6 = vrot.slane %v875_v27, 1  ;;  %v940_v61 = vrot.slane %v939_v35, 4 }
 0x1f8   : > { %v941_v22 = vadd.f32 %v940_v61, %v939_v35  ;;  %v877_v53 = vadd.f32 %v876_v6, %v875_v27 }
 0x1fa   : > { %v942_v40 = vrot.slane %v941_v22, 2  ;;  %v1361_v21 = vsel %vm1357_vm13, %v877_v53, 0.0 }
 0x1fb   : > { %v1365_v2 = vadd.f32 %v1361_v21, %v1356_v7 }
 0x1fc   : > { %v943_v39 = vadd.f32 %v942_v40, %v941_v22 }
 0x1fe   : > { %v944_v47 = vrot.slane %v943_v39, 1 }
 0x200   : > { %v945_v56 = vadd.f32 %v944_v47, %v943_v39 }
 0x202   : > { %v1370_v25 = vsel %vm1366_vm14, %v945_v56, 0.0 }
 0x203   : > { %v1374_v28 = vadd.f32 %v1370_v25, %v1365_v2 }
 0x205   : > { %1378 = vst [vmem:[%s2346_s13 + $0x3] sm:$0x1] %v1374_v28 }
 0x206 PF: > { %s14_s15 = sadd.s32 1, %s1588_s15  }
 0x207   : > { %p11_p4 = scmp.ge.s32.totalorder %s14_s15, 4  }
 0x209   :  { %13 = sbr.rel (!%p11_p4) target bundleno = 1 (0x1), region = 72 }

</bundles_post_ra>
